<compile_context>
chip_gen: v7x
topology: tpu7x:2x2x1
jax: 0.10.0
libtpu: 0.0.40
codegen_flags: <defaults>
</compile_context>

<pallas_src>
import jax
import jax.numpy as jnp
from jax import lax
from jax.experimental import pallas as pl
from jax.experimental.pallas import tpu as pltpu


# --------------------------------------------------------------------------
# Trace-time weight packing (tiny arrays, pure jnp, runs once under jit).
# Lane layouts:
#   conv1 output lane = ow*10 + oc   (ow<24, oc<10)   width 240 -> pad 256
#   conv2 output lane = ow2*20 + oc  (ow2<8,  oc<20)  width 160 -> pad 256
#   pooled1 valid lane = w1*20 + oc  (w1<12, oc<10)
#   pooled2 valid lane = w2*40 + oc  (w2<4,  oc<20)
# --------------------------------------------------------------------------
def _build_t1(w1):
    # T1[i, w, ow*10+oc] = w1[oc, 0, i, w-ow]  for 0 <= w-ow < 5
    w1s = w1[:, 0]                                       # (10, 5, 5)
    k = jnp.arange(5 * 32)[:, None]                      # (160, 1)
    l = jnp.arange(256)[None, :]                         # (1, 256)
    i, w = k // 32, k % 32
    ow, oc = l // 10, l % 10
    j = w - ow
    valid = (w < 28) & (l < 240) & (j >= 0) & (j < 5)
    vals = w1s[oc, i, jnp.clip(j, 0, 4)]
    t1 = jnp.where(valid, vals, 0.0).astype(jnp.bfloat16)
    return t1.reshape(5, 32, 256)


def _build_t2(w2):
    # T2[i*256 + w1*20 + c, ow2*20 + oc] = w2[oc, c, i, w1-ow2]
    k = jnp.arange(5 * 256)[:, None]                     # (1280, 1)
    l = jnp.arange(256)[None, :]                         # (1, 256)
    i, li = k // 256, k % 256
    w1i, c = li // 20, li % 20
    ow2, oc = l // 20, l % 20
    j = w1i - ow2
    valid = (c < 10) & (w1i < 12) & (l < 160) & (j >= 0) & (j < 5)
    vals = w2[oc, jnp.clip(c, 0, 9), i, jnp.clip(j, 0, 4)]
    return jnp.where(valid, vals, 0.0).astype(jnp.bfloat16)   # (1280, 256)


def _build_f1(fw1):
    # feat[h*256 + w2*40 + c] = pooled2[c, h, w2]; torch flatten index = c*16+h*4+w2
    k = jnp.arange(4 * 256)[:, None]                     # (1024, 1)
    n = jnp.arange(128)[None, :]                         # (1, 128)
    h, li = k // 256, k % 256
    w2i, c = li // 40, li % 40
    valid = (li < 160) & (c < 20) & (n < 50)
    col = jnp.clip(c, 0, 19) * 16 + h * 4 + jnp.clip(w2i, 0, 3)
    vals = fw1[jnp.clip(n, 0, 49), col]
    return jnp.where(valid, vals, 0.0).astype(jnp.bfloat16)   # (1024, 128)


def _build_f2(fw2):
    f2 = jnp.zeros((128, 128), jnp.float32).at[:50, :10].set(fw2.T)
    return f2.astype(jnp.bfloat16)


def _lane_bias(b, stride, count):
    l = jnp.arange(256)
    vec = jnp.where(l < stride * count, b[l % stride], 0.0)
    return vec[None, :].astype(jnp.float32)              # (1, 256)


# --------------------------------------------------------------------------
# Fused kernel (one grid step = one image)
# --------------------------------------------------------------------------
def _pool_pairs_lanes(v, n):
    """max(v[:, l], v[:, l+n]) at every lane (zeros shifted in at the top)."""
    z = jnp.zeros((v.shape[0], n), v.dtype)
    return jnp.maximum(v, jnp.concatenate([v[:, n:], z], axis=-1))


def _net_kernel(x_ref, t1_ref, b1_ref, t2_ref, b2_ref,
                f1_ref, fb1_ref, f2_ref, fb2_ref, o_ref):
    # ---- conv1: banded matmuls, output rows split by (oh mod 4) ----------
    def conv1_phase(r):
        acc = jnp.zeros((6, 256), jnp.float32)
        for i in range(5):
            s = r + i
            xs = x_ref[0, s % 4, (s // 4):(s // 4) + 6, :]      # (6, 32) bf16
            acc = acc + jnp.dot(xs, t1_ref[i],
                                preferred_element_type=jnp.float32)
        return acc                                              # (6, 256) f32

    a0, a1, a2, a3 = [conv1_phase(r) for r in range(4)]
    bias1 = b1_ref[...]
    z_e = jnp.maximum(a0, a1) + bias1        # pooled rows h1 = 2t   (oh = 4t, 4t+1)
    z_o = jnp.maximum(a2, a3) + bias1        # pooled rows h1 = 2t+1 (oh = 4t+2, 4t+3)
    p1 = (jnp.maximum(_pool_pairs_lanes(z_e, 10), 0.0).astype(jnp.bfloat16),
          jnp.maximum(_pool_pairs_lanes(z_o, 10), 0.0).astype(jnp.bfloat16))
    # p1[par][t, w1*20 + c] = relu(maxpool(conv1))[c, 2t+par, w1]

    # ---- conv2: banded matmul, output rows split by (oh2 mod 2) ----------
    def conv2_phase(s):
        pieces = []
        for i in range(5):
            t = s + i
            pieces.append(p1[t % 2][(t // 2):(t // 2) + 4, :])  # (4, 256) bf16
        lhs = jnp.concatenate(pieces, axis=-1)                  # (4, 1280)
        return jnp.dot(lhs, t2_ref[...],
                       preferred_element_type=jnp.float32)      # (4, 256) f32

    z2 = jnp.maximum(conv2_phase(0), conv2_phase(1)) + b2_ref[...]
    p2 = jnp.maximum(_pool_pairs_lanes(z2, 20), 0.0).astype(jnp.bfloat16)
    # p2[h2, w2*40 + c] = relu(maxpool(conv2))[c, h2, w2]

    # ---- fc1 -> relu -> fc2 -> masked log_softmax (lane-padded to 128) ---
    feat = jnp.concatenate([p2[h:h + 1, :] for h in range(4)], axis=-1)  # (1, 1024)
    hid = jnp.dot(feat, f1_ref[...],
                  preferred_element_type=jnp.float32) + fb1_ref[...]
    hid = jnp.maximum(hid, 0.0).astype(jnp.bfloat16)                     # (1, 128)
    z = jnp.dot(hid, f2_ref[...],
                preferred_element_type=jnp.float32) + fb2_ref[...]       # (1, 128)

    lane = lax.broadcasted_iota(jnp.int32, z.shape, 1)
    zm = jnp.where(lane < 10, z, -jnp.inf)
    m = jnp.max(zm, axis=-1, keepdims=True)
    lse = jnp.log(jnp.sum(jnp.exp(zm - m), axis=-1, keepdims=True)) + m
    o_ref[0] = z - lse


# --------------------------------------------------------------------------
# Forward pass
# --------------------------------------------------------------------------
def net_forward(x, params):
    w1, b1, w2, b2, fw1, fb1, fw2, fb2 = params
    B = x.shape[0]

    # Input: (B,1,28,28) -> pad width to 32 lanes, split rows by (row mod 4)
    xp = jnp.pad(x.reshape(B, 28, 28), ((0, 0), (0, 0), (0, 4)))
    xph = xp.reshape(B, 7, 4, 32).transpose(0, 2, 1, 3).astype(jnp.bfloat16)

    t1 = _build_t1(w1)
    t2 = _build_t2(w2)
    f1 = _build_f1(fw1)
    f2 = _build_f2(fw2)
    b1l = _lane_bias(b1, 10, 24)
    b2l = _lane_bias(b2, 20, 8)
    fb1p = jnp.pad(fb1, (0, 128 - 50))[None, :].astype(jnp.float32)
    fb2p = jnp.pad(fb2, (0, 128 - 10))[None, :].astype(jnp.float32)

    def const_spec(shape):
        return pl.BlockSpec(shape, lambda b: (0,) * len(shape))

    out = pl.pallas_call(
        _net_kernel,
        out_shape=jax.ShapeDtypeStruct((B, 1, 128), jnp.float32),
        grid=(B,),
        in_specs=[
            pl.BlockSpec((1, 4, 7, 32), lambda b: (b, 0, 0, 0)),  # x (phase-split)
            const_spec((5, 32, 256)),                             # conv1 Toeplitz
            const_spec((1, 256)),                                 # conv1 bias (lane layout)
            const_spec((1280, 256)),                              # conv2 Toeplitz
            const_spec((1, 256)),                                 # conv2 bias
            const_spec((1024, 128)),                              # fc1 (permuted + padded)
            const_spec((1, 128)),                                 # fc1 bias
            const_spec((128, 128)),                               # fc2 (padded)
            const_spec((1, 128)),                                 # fc2 bias
        ],
        out_specs=pl.BlockSpec((1, 1, 128), lambda b: (b, 0, 0)),
        compiler_params=pltpu.CompilerParams(
            dimension_semantics=("parallel",)),
    )(xph, t1, b1l, t2, b2l, f1, fb1p, f2, fb2p)

    return out[:, 0, :10]


# --------------------------------------------------------------------------
# Pure-JAX reference (f32) and parameter init
# --------------------------------------------------------------------------
def reference(x, params):
    w1, b1, w2, b2, fw1, fb1, fw2, fb2 = params
    dn = ('NCHW', 'OIHW', 'NCHW')
    y = lax.conv_general_dilated(x, w1, (1, 1), 'VALID', dimension_numbers=dn)
    y = y + b1[None, :, None, None]
    y = lax.reduce_window(y, -jnp.inf, lax.max, (1, 1, 2, 2), (1, 1, 2, 2), 'VALID')
    y = jnp.maximum(y, 0.0)
    y = lax.conv_general_dilated(y, w2, (1, 1), 'VALID', dimension_numbers=dn)
    y = y + b2[None, :, None, None]
    y = lax.reduce_window(y, -jnp.inf, lax.max, (1, 1, 2, 2), (1, 1, 2, 2), 'VALID')
    y = jnp.maximum(y, 0.0)
    y = y.reshape(x.shape[0], 320)
    h = jnp.maximum(y @ fw1.T + fb1, 0.0)
    z = h @ fw2.T + fb2
    return jax.nn.log_softmax(z, axis=1)


def init_params(key):
    def uniform(k, shape, fan_in):
        bound = 1.0 / jnp.sqrt(jnp.float32(fan_in))
        return jax.random.uniform(k, shape, jnp.float32, -bound, bound)

    ks = jax.random.split(key, 8)
    w1 = uniform(ks[0], (10, 1, 5, 5), 1 * 5 * 5)
    b1 = uniform(ks[1], (10,), 1 * 5 * 5)
    w2 = uniform(ks[2], (20, 10, 5, 5), 10 * 5 * 5)
    b2 = uniform(ks[3], (20,), 10 * 5 * 5)
    fw1 = uniform(ks[4], (50, 320), 320)
    fb1 = uniform(ks[5], (50,), 320)
    fw2 = uniform(ks[6], (10, 50), 50)
    fb2 = uniform(ks[7], (10,), 50)
    return (w1, b1, w2, b2, fw1, fb1, fw2, fb2)


if __name__ == "__main__":
    key = jax.random.PRNGKey(0)
    kx, kp = jax.random.split(key)
    # MNIST-shaped input (the 320-wide flatten requires 28x28 single channel).
    x = jax.random.normal(kx, (2, 1, 28, 28), dtype=jnp.float32)
    params = init_params(kp)

    out = jax.block_until_ready(jax.jit(net_forward)(x, params))
    ref = jax.block_until_ready(reference(x, params))
    assert out.shape == (2, 10)
    # bf16 MXU inputs with f32 accumulation -> allow a little slack vs f32 ref.
    assert jnp.allclose(out, ref, atol=2e-2, rtol=2e-2), \
        float(jnp.max(jnp.abs(out - ref)))
    print("KERNEL_OK")
</pallas_src>

<mosaic_0001>
module attributes {stable_mosaic.version = 11 : i64} {
  func.func @_net_kernel(%arg0: i32, %arg1: memref<1x4x7x32xbf16, #tpu.memory_space<vmem>>, %arg2: memref<5x32x256xbf16, #tpu.memory_space<vmem>>, %arg3: memref<1x256xf32, #tpu.memory_space<vmem>>, %arg4: memref<1280x256xbf16, #tpu.memory_space<vmem>>, %arg5: memref<1x256xf32, #tpu.memory_space<vmem>>, %arg6: memref<1024x128xbf16, #tpu.memory_space<vmem>>, %arg7: memref<1x128xf32, #tpu.memory_space<vmem>>, %arg8: memref<128x128xbf16, #tpu.memory_space<vmem>>, %arg9: memref<1x128xf32, #tpu.memory_space<vmem>>, %arg10: memref<1x1x128xf32, #tpu.memory_space<vmem>>) attributes {dimension_semantics = [#tpu.dimension_semantics<parallel>], iteration_bounds = array<i64: 2>, scalar_prefetch = 0 : i64, scratch_operands = 0 : i64, tpu.core_type = #tpu.core_type<tc>, window_params = [{transform_indices = @transform_0, window_bounds = array<i64: 1, 4, 7, 32>}, {pipeline_mode = #tpu.pipeline_mode<synchronous>, transform_indices = @transform_1, window_bounds = array<i64: 5, 32, 256>}, {pipeline_mode = #tpu.pipeline_mode<synchronous>, transform_indices = @transform_2, window_bounds = array<i64: 1, 256>}, {pipeline_mode = #tpu.pipeline_mode<synchronous>, transform_indices = @transform_3, window_bounds = array<i64: 1280, 256>}, {pipeline_mode = #tpu.pipeline_mode<synchronous>, transform_indices = @transform_4, window_bounds = array<i64: 1, 256>}, {pipeline_mode = #tpu.pipeline_mode<synchronous>, transform_indices = @transform_5, window_bounds = array<i64: 1024, 128>}, {pipeline_mode = #tpu.pipeline_mode<synchronous>, transform_indices = @transform_6, window_bounds = array<i64: 1, 128>}, {pipeline_mode = #tpu.pipeline_mode<synchronous>, transform_indices = @transform_7, window_bounds = array<i64: 128, 128>}, {pipeline_mode = #tpu.pipeline_mode<synchronous>, transform_indices = @transform_8, window_bounds = array<i64: 1, 128>}, {transform_indices = @transform_9, window_bounds = array<i64: 1, 1, 128>}]} {
    %cst = arith.constant 0.000000e+00 : f32
    %0 = vector.broadcast %cst : f32 to vector<6x256xf32>
    %c0 = arith.constant 0 : index
    %c0_0 = arith.constant 0 : index
    %c0_1 = arith.constant 0 : index
    %c0_2 = arith.constant 0 : index
    %1 = vector.load %arg1[%c0, %c0_0, %c0_1, %c0_2] : memref<1x4x7x32xbf16, #tpu.memory_space<vmem>>, vector<1x1x6x32xbf16>
    %2 = vector.shape_cast %1 : vector<1x1x6x32xbf16> to vector<6x32xbf16>
    %c0_3 = arith.constant 0 : index
    %c0_4 = arith.constant 0 : index
    %c0_5 = arith.constant 0 : index
    %3 = vector.load %arg2[%c0_3, %c0_4, %c0_5] : memref<5x32x256xbf16, #tpu.memory_space<vmem>>, vector<1x32x256xbf16>
    %4 = vector.shape_cast %3 : vector<1x32x256xbf16> to vector<32x256xbf16>
    %cst_6 = arith.constant dense<0.000000e+00> : vector<6x256xf32>
    %5 = tpu.matmul %2, %4, %cst_6 {dimension_numbers = #tpu.dot_dimension_numbers<[1], [0], [0], [1], [0, 0, 1, 1], [], []>} : vector<6x32xbf16>, vector<32x256xbf16>, vector<6x256xf32> -> vector<6x256xf32>
    %6 = arith.addf %0, %5 : vector<6x256xf32>
    %c0_7 = arith.constant 0 : index
    %c1 = arith.constant 1 : index
    %c0_8 = arith.constant 0 : index
    %c0_9 = arith.constant 0 : index
    %7 = vector.load %arg1[%c0_7, %c1, %c0_8, %c0_9] : memref<1x4x7x32xbf16, #tpu.memory_space<vmem>>, vector<1x1x6x32xbf16>
    %8 = vector.shape_cast %7 : vector<1x1x6x32xbf16> to vector<6x32xbf16>
    %c1_10 = arith.constant 1 : index
    %c0_11 = arith.constant 0 : index
    %c0_12 = arith.constant 0 : index
    %9 = vector.load %arg2[%c1_10, %c0_11, %c0_12] : memref<5x32x256xbf16, #tpu.memory_space<vmem>>, vector<1x32x256xbf16>
    %10 = vector.shape_cast %9 : vector<1x32x256xbf16> to vector<32x256xbf16>
    %cst_13 = arith.constant dense<0.000000e+00> : vector<6x256xf32>
    %11 = tpu.matmul %8, %10, %cst_13 {dimension_numbers = #tpu.dot_dimension_numbers<[1], [0], [0], [1], [0, 0, 1, 1], [], []>} : vector<6x32xbf16>, vector<32x256xbf16>, vector<6x256xf32> -> vector<6x256xf32>
    %12 = arith.addf %6, %11 : vector<6x256xf32>
    %c0_14 = arith.constant 0 : index
    %c2 = arith.constant 2 : index
    %c0_15 = arith.constant 0 : index
    %c0_16 = arith.constant 0 : index
    %13 = vector.load %arg1[%c0_14, %c2, %c0_15, %c0_16] : memref<1x4x7x32xbf16, #tpu.memory_space<vmem>>, vector<1x1x6x32xbf16>
    %14 = vector.shape_cast %13 : vector<1x1x6x32xbf16> to vector<6x32xbf16>
    %c2_17 = arith.constant 2 : index
    %c0_18 = arith.constant 0 : index
    %c0_19 = arith.constant 0 : index
    %15 = vector.load %arg2[%c2_17, %c0_18, %c0_19] : memref<5x32x256xbf16, #tpu.memory_space<vmem>>, vector<1x32x256xbf16>
    %16 = vector.shape_cast %15 : vector<1x32x256xbf16> to vector<32x256xbf16>
    %cst_20 = arith.constant dense<0.000000e+00> : vector<6x256xf32>
    %17 = tpu.matmul %14, %16, %cst_20 {dimension_numbers = #tpu.dot_dimension_numbers<[1], [0], [0], [1], [0, 0, 1, 1], [], []>} : vector<6x32xbf16>, vector<32x256xbf16>, vector<6x256xf32> -> vector<6x256xf32>
    %18 = arith.addf %12, %17 : vector<6x256xf32>
    %c0_21 = arith.constant 0 : index
    %c3 = arith.constant 3 : index
    %c0_22 = arith.constant 0 : index
    %c0_23 = arith.constant 0 : index
    %19 = vector.load %arg1[%c0_21, %c3, %c0_22, %c0_23] : memref<1x4x7x32xbf16, #tpu.memory_space<vmem>>, vector<1x1x6x32xbf16>
    %20 = vector.shape_cast %19 : vector<1x1x6x32xbf16> to vector<6x32xbf16>
    %c3_24 = arith.constant 3 : index
    %c0_25 = arith.constant 0 : index
    %c0_26 = arith.constant 0 : index
    %21 = vector.load %arg2[%c3_24, %c0_25, %c0_26] : memref<5x32x256xbf16, #tpu.memory_space<vmem>>, vector<1x32x256xbf16>
    %22 = vector.shape_cast %21 : vector<1x32x256xbf16> to vector<32x256xbf16>
    %cst_27 = arith.constant dense<0.000000e+00> : vector<6x256xf32>
    %23 = tpu.matmul %20, %22, %cst_27 {dimension_numbers = #tpu.dot_dimension_numbers<[1], [0], [0], [1], [0, 0, 1, 1], [], []>} : vector<6x32xbf16>, vector<32x256xbf16>, vector<6x256xf32> -> vector<6x256xf32>
    %24 = arith.addf %18, %23 : vector<6x256xf32>
    %c0_28 = arith.constant 0 : index
    %c0_29 = arith.constant 0 : index
    %c1_30 = arith.constant 1 : index
    %c0_31 = arith.constant 0 : index
    %25 = vector.load %arg1[%c0_28, %c0_29, %c1_30, %c0_31] : memref<1x4x7x32xbf16, #tpu.memory_space<vmem>>, vector<1x1x6x32xbf16>
    %26 = vector.shape_cast %25 : vector<1x1x6x32xbf16> to vector<6x32xbf16>
    %c4 = arith.constant 4 : index
    %c0_32 = arith.constant 0 : index
    %c0_33 = arith.constant 0 : index
    %27 = vector.load %arg2[%c4, %c0_32, %c0_33] : memref<5x32x256xbf16, #tpu.memory_space<vmem>>, vector<1x32x256xbf16>
    %28 = vector.shape_cast %27 : vector<1x32x256xbf16> to vector<32x256xbf16>
    %cst_34 = arith.constant dense<0.000000e+00> : vector<6x256xf32>
    %29 = tpu.matmul %26, %28, %cst_34 {dimension_numbers = #tpu.dot_dimension_numbers<[1], [0], [0], [1], [0, 0, 1, 1], [], []>} : vector<6x32xbf16>, vector<32x256xbf16>, vector<6x256xf32> -> vector<6x256xf32>
    %30 = arith.addf %24, %29 : vector<6x256xf32>
    %cst_35 = arith.constant 0.000000e+00 : f32
    %31 = vector.broadcast %cst_35 : f32 to vector<6x256xf32>
    %c0_36 = arith.constant 0 : index
    %c1_37 = arith.constant 1 : index
    %c0_38 = arith.constant 0 : index
    %c0_39 = arith.constant 0 : index
    %32 = vector.load %arg1[%c0_36, %c1_37, %c0_38, %c0_39] : memref<1x4x7x32xbf16, #tpu.memory_space<vmem>>, vector<1x1x6x32xbf16>
    %33 = vector.shape_cast %32 : vector<1x1x6x32xbf16> to vector<6x32xbf16>
    %c0_40 = arith.constant 0 : index
    %c0_41 = arith.constant 0 : index
    %c0_42 = arith.constant 0 : index
    %34 = vector.load %arg2[%c0_40, %c0_41, %c0_42] : memref<5x32x256xbf16, #tpu.memory_space<vmem>>, vector<1x32x256xbf16>
    %35 = vector.shape_cast %34 : vector<1x32x256xbf16> to vector<32x256xbf16>
    %cst_43 = arith.constant dense<0.000000e+00> : vector<6x256xf32>
    %36 = tpu.matmul %33, %35, %cst_43 {dimension_numbers = #tpu.dot_dimension_numbers<[1], [0], [0], [1], [0, 0, 1, 1], [], []>} : vector<6x32xbf16>, vector<32x256xbf16>, vector<6x256xf32> -> vector<6x256xf32>
    %37 = arith.addf %31, %36 : vector<6x256xf32>
    %c0_44 = arith.constant 0 : index
    %c2_45 = arith.constant 2 : index
    %c0_46 = arith.constant 0 : index
    %c0_47 = arith.constant 0 : index
    %38 = vector.load %arg1[%c0_44, %c2_45, %c0_46, %c0_47] : memref<1x4x7x32xbf16, #tpu.memory_space<vmem>>, vector<1x1x6x32xbf16>
    %39 = vector.shape_cast %38 : vector<1x1x6x32xbf16> to vector<6x32xbf16>
    %c1_48 = arith.constant 1 : index
    %c0_49 = arith.constant 0 : index
    %c0_50 = arith.constant 0 : index
    %40 = vector.load %arg2[%c1_48, %c0_49, %c0_50] : memref<5x32x256xbf16, #tpu.memory_space<vmem>>, vector<1x32x256xbf16>
    %41 = vector.shape_cast %40 : vector<1x32x256xbf16> to vector<32x256xbf16>
    %cst_51 = arith.constant dense<0.000000e+00> : vector<6x256xf32>
    %42 = tpu.matmul %39, %41, %cst_51 {dimension_numbers = #tpu.dot_dimension_numbers<[1], [0], [0], [1], [0, 0, 1, 1], [], []>} : vector<6x32xbf16>, vector<32x256xbf16>, vector<6x256xf32> -> vector<6x256xf32>
    %43 = arith.addf %37, %42 : vector<6x256xf32>
    %c0_52 = arith.constant 0 : index
    %c3_53 = arith.constant 3 : index
    %c0_54 = arith.constant 0 : index
    %c0_55 = arith.constant 0 : index
    %44 = vector.load %arg1[%c0_52, %c3_53, %c0_54, %c0_55] : memref<1x4x7x32xbf16, #tpu.memory_space<vmem>>, vector<1x1x6x32xbf16>
    %45 = vector.shape_cast %44 : vector<1x1x6x32xbf16> to vector<6x32xbf16>
    %c2_56 = arith.constant 2 : index
    %c0_57 = arith.constant 0 : index
    %c0_58 = arith.constant 0 : index
    %46 = vector.load %arg2[%c2_56, %c0_57, %c0_58] : memref<5x32x256xbf16, #tpu.memory_space<vmem>>, vector<1x32x256xbf16>
    %47 = vector.shape_cast %46 : vector<1x32x256xbf16> to vector<32x256xbf16>
    %cst_59 = arith.constant dense<0.000000e+00> : vector<6x256xf32>
    %48 = tpu.matmul %45, %47, %cst_59 {dimension_numbers = #tpu.dot_dimension_numbers<[1], [0], [0], [1], [0, 0, 1, 1], [], []>} : vector<6x32xbf16>, vector<32x256xbf16>, vector<6x256xf32> -> vector<6x256xf32>
    %49 = arith.addf %43, %48 : vector<6x256xf32>
    %c0_60 = arith.constant 0 : index
    %c0_61 = arith.constant 0 : index
    %c1_62 = arith.constant 1 : index
    %c0_63 = arith.constant 0 : index
    %50 = vector.load %arg1[%c0_60, %c0_61, %c1_62, %c0_63] : memref<1x4x7x32xbf16, #tpu.memory_space<vmem>>, vector<1x1x6x32xbf16>
    %51 = vector.shape_cast %50 : vector<1x1x6x32xbf16> to vector<6x32xbf16>
    %c3_64 = arith.constant 3 : index
    %c0_65 = arith.constant 0 : index
    %c0_66 = arith.constant 0 : index
    %52 = vector.load %arg2[%c3_64, %c0_65, %c0_66] : memref<5x32x256xbf16, #tpu.memory_space<vmem>>, vector<1x32x256xbf16>
    %53 = vector.shape_cast %52 : vector<1x32x256xbf16> to vector<32x256xbf16>
    %cst_67 = arith.constant dense<0.000000e+00> : vector<6x256xf32>
    %54 = tpu.matmul %51, %53, %cst_67 {dimension_numbers = #tpu.dot_dimension_numbers<[1], [0], [0], [1], [0, 0, 1, 1], [], []>} : vector<6x32xbf16>, vector<32x256xbf16>, vector<6x256xf32> -> vector<6x256xf32>
    %55 = arith.addf %49, %54 : vector<6x256xf32>
    %c0_68 = arith.constant 0 : index
    %c1_69 = arith.constant 1 : index
    %c1_70 = arith.constant 1 : index
    %c0_71 = arith.constant 0 : index
    %56 = vector.load %arg1[%c0_68, %c1_69, %c1_70, %c0_71] : memref<1x4x7x32xbf16, #tpu.memory_space<vmem>>, vector<1x1x6x32xbf16>
    %57 = vector.shape_cast %56 : vector<1x1x6x32xbf16> to vector<6x32xbf16>
    %c4_72 = arith.constant 4 : index
    %c0_73 = arith.constant 0 : index
    %c0_74 = arith.constant 0 : index
    %58 = vector.load %arg2[%c4_72, %c0_73, %c0_74] : memref<5x32x256xbf16, #tpu.memory_space<vmem>>, vector<1x32x256xbf16>
    %59 = vector.shape_cast %58 : vector<1x32x256xbf16> to vector<32x256xbf16>
    %cst_75 = arith.constant dense<0.000000e+00> : vector<6x256xf32>
    %60 = tpu.matmul %57, %59, %cst_75 {dimension_numbers = #tpu.dot_dimension_numbers<[1], [0], [0], [1], [0, 0, 1, 1], [], []>} : vector<6x32xbf16>, vector<32x256xbf16>, vector<6x256xf32> -> vector<6x256xf32>
    %61 = arith.addf %55, %60 : vector<6x256xf32>
    %cst_76 = arith.constant 0.000000e+00 : f32
    %62 = vector.broadcast %cst_76 : f32 to vector<6x256xf32>
    %c0_77 = arith.constant 0 : index
    %c2_78 = arith.constant 2 : index
    %c0_79 = arith.constant 0 : index
    %c0_80 = arith.constant 0 : index
    %63 = vector.load %arg1[%c0_77, %c2_78, %c0_79, %c0_80] : memref<1x4x7x32xbf16, #tpu.memory_space<vmem>>, vector<1x1x6x32xbf16>
    %64 = vector.shape_cast %63 : vector<1x1x6x32xbf16> to vector<6x32xbf16>
    %c0_81 = arith.constant 0 : index
    %c0_82 = arith.constant 0 : index
    %c0_83 = arith.constant 0 : index
    %65 = vector.load %arg2[%c0_81, %c0_82, %c0_83] : memref<5x32x256xbf16, #tpu.memory_space<vmem>>, vector<1x32x256xbf16>
    %66 = vector.shape_cast %65 : vector<1x32x256xbf16> to vector<32x256xbf16>
    %cst_84 = arith.constant dense<0.000000e+00> : vector<6x256xf32>
    %67 = tpu.matmul %64, %66, %cst_84 {dimension_numbers = #tpu.dot_dimension_numbers<[1], [0], [0], [1], [0, 0, 1, 1], [], []>} : vector<6x32xbf16>, vector<32x256xbf16>, vector<6x256xf32> -> vector<6x256xf32>
    %68 = arith.addf %62, %67 : vector<6x256xf32>
    %c0_85 = arith.constant 0 : index
    %c3_86 = arith.constant 3 : index
    %c0_87 = arith.constant 0 : index
    %c0_88 = arith.constant 0 : index
    %69 = vector.load %arg1[%c0_85, %c3_86, %c0_87, %c0_88] : memref<1x4x7x32xbf16, #tpu.memory_space<vmem>>, vector<1x1x6x32xbf16>
    %70 = vector.shape_cast %69 : vector<1x1x6x32xbf16> to vector<6x32xbf16>
    %c1_89 = arith.constant 1 : index
    %c0_90 = arith.constant 0 : index
    %c0_91 = arith.constant 0 : index
    %71 = vector.load %arg2[%c1_89, %c0_90, %c0_91] : memref<5x32x256xbf16, #tpu.memory_space<vmem>>, vector<1x32x256xbf16>
    %72 = vector.shape_cast %71 : vector<1x32x256xbf16> to vector<32x256xbf16>
    %cst_92 = arith.constant dense<0.000000e+00> : vector<6x256xf32>
    %73 = tpu.matmul %70, %72, %cst_92 {dimension_numbers = #tpu.dot_dimension_numbers<[1], [0], [0], [1], [0, 0, 1, 1], [], []>} : vector<6x32xbf16>, vector<32x256xbf16>, vector<6x256xf32> -> vector<6x256xf32>
    %74 = arith.addf %68, %73 : vector<6x256xf32>
    %c0_93 = arith.constant 0 : index
    %c0_94 = arith.constant 0 : index
    %c1_95 = arith.constant 1 : index
    %c0_96 = arith.constant 0 : index
    %75 = vector.load %arg1[%c0_93, %c0_94, %c1_95, %c0_96] : memref<1x4x7x32xbf16, #tpu.memory_space<vmem>>, vector<1x1x6x32xbf16>
    %76 = vector.shape_cast %75 : vector<1x1x6x32xbf16> to vector<6x32xbf16>
    %c2_97 = arith.constant 2 : index
    %c0_98 = arith.constant 0 : index
    %c0_99 = arith.constant 0 : index
    %77 = vector.load %arg2[%c2_97, %c0_98, %c0_99] : memref<5x32x256xbf16, #tpu.memory_space<vmem>>, vector<1x32x256xbf16>
    %78 = vector.shape_cast %77 : vector<1x32x256xbf16> to vector<32x256xbf16>
    %cst_100 = arith.constant dense<0.000000e+00> : vector<6x256xf32>
    %79 = tpu.matmul %76, %78, %cst_100 {dimension_numbers = #tpu.dot_dimension_numbers<[1], [0], [0], [1], [0, 0, 1, 1], [], []>} : vector<6x32xbf16>, vector<32x256xbf16>, vector<6x256xf32> -> vector<6x256xf32>
    %80 = arith.addf %74, %79 : vector<6x256xf32>
    %c0_101 = arith.constant 0 : index
    %c1_102 = arith.constant 1 : index
    %c1_103 = arith.constant 1 : index
    %c0_104 = arith.constant 0 : index
    %81 = vector.load %arg1[%c0_101, %c1_102, %c1_103, %c0_104] : memref<1x4x7x32xbf16, #tpu.memory_space<vmem>>, vector<1x1x6x32xbf16>
    %82 = vector.shape_cast %81 : vector<1x1x6x32xbf16> to vector<6x32xbf16>
    %c3_105 = arith.constant 3 : index
    %c0_106 = arith.constant 0 : index
    %c0_107 = arith.constant 0 : index
    %83 = vector.load %arg2[%c3_105, %c0_106, %c0_107] : memref<5x32x256xbf16, #tpu.memory_space<vmem>>, vector<1x32x256xbf16>
    %84 = vector.shape_cast %83 : vector<1x32x256xbf16> to vector<32x256xbf16>
    %cst_108 = arith.constant dense<0.000000e+00> : vector<6x256xf32>
    %85 = tpu.matmul %82, %84, %cst_108 {dimension_numbers = #tpu.dot_dimension_numbers<[1], [0], [0], [1], [0, 0, 1, 1], [], []>} : vector<6x32xbf16>, vector<32x256xbf16>, vector<6x256xf32> -> vector<6x256xf32>
    %86 = arith.addf %80, %85 : vector<6x256xf32>
    %c0_109 = arith.constant 0 : index
    %c2_110 = arith.constant 2 : index
    %c1_111 = arith.constant 1 : index
    %c0_112 = arith.constant 0 : index
    %87 = vector.load %arg1[%c0_109, %c2_110, %c1_111, %c0_112] : memref<1x4x7x32xbf16, #tpu.memory_space<vmem>>, vector<1x1x6x32xbf16>
    %88 = vector.shape_cast %87 : vector<1x1x6x32xbf16> to vector<6x32xbf16>
    %c4_113 = arith.constant 4 : index
    %c0_114 = arith.constant 0 : index
    %c0_115 = arith.constant 0 : index
    %89 = vector.load %arg2[%c4_113, %c0_114, %c0_115] : memref<5x32x256xbf16, #tpu.memory_space<vmem>>, vector<1x32x256xbf16>
    %90 = vector.shape_cast %89 : vector<1x32x256xbf16> to vector<32x256xbf16>
    %cst_116 = arith.constant dense<0.000000e+00> : vector<6x256xf32>
    %91 = tpu.matmul %88, %90, %cst_116 {dimension_numbers = #tpu.dot_dimension_numbers<[1], [0], [0], [1], [0, 0, 1, 1], [], []>} : vector<6x32xbf16>, vector<32x256xbf16>, vector<6x256xf32> -> vector<6x256xf32>
    %92 = arith.addf %86, %91 : vector<6x256xf32>
    %cst_117 = arith.constant 0.000000e+00 : f32
    %93 = vector.broadcast %cst_117 : f32 to vector<6x256xf32>
    %c0_118 = arith.constant 0 : index
    %c3_119 = arith.constant 3 : index
    %c0_120 = arith.constant 0 : index
    %c0_121 = arith.constant 0 : index
    %94 = vector.load %arg1[%c0_118, %c3_119, %c0_120, %c0_121] : memref<1x4x7x32xbf16, #tpu.memory_space<vmem>>, vector<1x1x6x32xbf16>
    %95 = vector.shape_cast %94 : vector<1x1x6x32xbf16> to vector<6x32xbf16>
    %c0_122 = arith.constant 0 : index
    %c0_123 = arith.constant 0 : index
    %c0_124 = arith.constant 0 : index
    %96 = vector.load %arg2[%c0_122, %c0_123, %c0_124] : memref<5x32x256xbf16, #tpu.memory_space<vmem>>, vector<1x32x256xbf16>
    %97 = vector.shape_cast %96 : vector<1x32x256xbf16> to vector<32x256xbf16>
    %cst_125 = arith.constant dense<0.000000e+00> : vector<6x256xf32>
    %98 = tpu.matmul %95, %97, %cst_125 {dimension_numbers = #tpu.dot_dimension_numbers<[1], [0], [0], [1], [0, 0, 1, 1], [], []>} : vector<6x32xbf16>, vector<32x256xbf16>, vector<6x256xf32> -> vector<6x256xf32>
    %99 = arith.addf %93, %98 : vector<6x256xf32>
    %c0_126 = arith.constant 0 : index
    %c0_127 = arith.constant 0 : index
    %c1_128 = arith.constant 1 : index
    %c0_129 = arith.constant 0 : index
    %100 = vector.load %arg1[%c0_126, %c0_127, %c1_128, %c0_129] : memref<1x4x7x32xbf16, #tpu.memory_space<vmem>>, vector<1x1x6x32xbf16>
    %101 = vector.shape_cast %100 : vector<1x1x6x32xbf16> to vector<6x32xbf16>
    %c1_130 = arith.constant 1 : index
    %c0_131 = arith.constant 0 : index
    %c0_132 = arith.constant 0 : index
    %102 = vector.load %arg2[%c1_130, %c0_131, %c0_132] : memref<5x32x256xbf16, #tpu.memory_space<vmem>>, vector<1x32x256xbf16>
    %103 = vector.shape_cast %102 : vector<1x32x256xbf16> to vector<32x256xbf16>
    %cst_133 = arith.constant dense<0.000000e+00> : vector<6x256xf32>
    %104 = tpu.matmul %101, %103, %cst_133 {dimension_numbers = #tpu.dot_dimension_numbers<[1], [0], [0], [1], [0, 0, 1, 1], [], []>} : vector<6x32xbf16>, vector<32x256xbf16>, vector<6x256xf32> -> vector<6x256xf32>
    %105 = arith.addf %99, %104 : vector<6x256xf32>
    %c0_134 = arith.constant 0 : index
    %c1_135 = arith.constant 1 : index
    %c1_136 = arith.constant 1 : index
    %c0_137 = arith.constant 0 : index
    %106 = vector.load %arg1[%c0_134, %c1_135, %c1_136, %c0_137] : memref<1x4x7x32xbf16, #tpu.memory_space<vmem>>, vector<1x1x6x32xbf16>
    %107 = vector.shape_cast %106 : vector<1x1x6x32xbf16> to vector<6x32xbf16>
    %c2_138 = arith.constant 2 : index
    %c0_139 = arith.constant 0 : index
    %c0_140 = arith.constant 0 : index
    %108 = vector.load %arg2[%c2_138, %c0_139, %c0_140] : memref<5x32x256xbf16, #tpu.memory_space<vmem>>, vector<1x32x256xbf16>
    %109 = vector.shape_cast %108 : vector<1x32x256xbf16> to vector<32x256xbf16>
    %cst_141 = arith.constant dense<0.000000e+00> : vector<6x256xf32>
    %110 = tpu.matmul %107, %109, %cst_141 {dimension_numbers = #tpu.dot_dimension_numbers<[1], [0], [0], [1], [0, 0, 1, 1], [], []>} : vector<6x32xbf16>, vector<32x256xbf16>, vector<6x256xf32> -> vector<6x256xf32>
    %111 = arith.addf %105, %110 : vector<6x256xf32>
    %c0_142 = arith.constant 0 : index
    %c2_143 = arith.constant 2 : index
    %c1_144 = arith.constant 1 : index
    %c0_145 = arith.constant 0 : index
    %112 = vector.load %arg1[%c0_142, %c2_143, %c1_144, %c0_145] : memref<1x4x7x32xbf16, #tpu.memory_space<vmem>>, vector<1x1x6x32xbf16>
    %113 = vector.shape_cast %112 : vector<1x1x6x32xbf16> to vector<6x32xbf16>
    %c3_146 = arith.constant 3 : index
    %c0_147 = arith.constant 0 : index
    %c0_148 = arith.constant 0 : index
    %114 = vector.load %arg2[%c3_146, %c0_147, %c0_148] : memref<5x32x256xbf16, #tpu.memory_space<vmem>>, vector<1x32x256xbf16>
    %115 = vector.shape_cast %114 : vector<1x32x256xbf16> to vector<32x256xbf16>
    %cst_149 = arith.constant dense<0.000000e+00> : vector<6x256xf32>
    %116 = tpu.matmul %113, %115, %cst_149 {dimension_numbers = #tpu.dot_dimension_numbers<[1], [0], [0], [1], [0, 0, 1, 1], [], []>} : vector<6x32xbf16>, vector<32x256xbf16>, vector<6x256xf32> -> vector<6x256xf32>
    %117 = arith.addf %111, %116 : vector<6x256xf32>
    %c0_150 = arith.constant 0 : index
    %c3_151 = arith.constant 3 : index
    %c1_152 = arith.constant 1 : index
    %c0_153 = arith.constant 0 : index
    %118 = vector.load %arg1[%c0_150, %c3_151, %c1_152, %c0_153] : memref<1x4x7x32xbf16, #tpu.memory_space<vmem>>, vector<1x1x6x32xbf16>
    %119 = vector.shape_cast %118 : vector<1x1x6x32xbf16> to vector<6x32xbf16>
    %c4_154 = arith.constant 4 : index
    %c0_155 = arith.constant 0 : index
    %c0_156 = arith.constant 0 : index
    %120 = vector.load %arg2[%c4_154, %c0_155, %c0_156] : memref<5x32x256xbf16, #tpu.memory_space<vmem>>, vector<1x32x256xbf16>
    %121 = vector.shape_cast %120 : vector<1x32x256xbf16> to vector<32x256xbf16>
    %cst_157 = arith.constant dense<0.000000e+00> : vector<6x256xf32>
    %122 = tpu.matmul %119, %121, %cst_157 {dimension_numbers = #tpu.dot_dimension_numbers<[1], [0], [0], [1], [0, 0, 1, 1], [], []>} : vector<6x32xbf16>, vector<32x256xbf16>, vector<6x256xf32> -> vector<6x256xf32>
    %123 = arith.addf %117, %122 : vector<6x256xf32>
    %c0_158 = arith.constant 0 : index
    %c0_159 = arith.constant 0 : index
    %124 = vector.load %arg3[%c0_158, %c0_159] : memref<1x256xf32, #tpu.memory_space<vmem>>, vector<1x256xf32>
    %125 = arith.maximumf %30, %61 : vector<6x256xf32>
    %126 = vector.broadcast %124 : vector<1x256xf32> to vector<6x256xf32>
    %127 = arith.addf %125, %126 : vector<6x256xf32>
    %128 = arith.maximumf %92, %123 : vector<6x256xf32>
    %129 = vector.broadcast %124 : vector<1x256xf32> to vector<6x256xf32>
    %130 = arith.addf %128, %129 : vector<6x256xf32>
    %cst_160 = arith.constant 0.000000e+00 : f32
    %131 = vector.broadcast %cst_160 : f32 to vector<6x10xf32>
    %132 = vector.extract_strided_slice %127 {offsets = [0, 10], sizes = [6, 246], strides = [1, 1]} : vector<6x256xf32> to vector<6x246xf32>
    %133 = tpu.concatenate %132, %131 in 1 : vector<6x246xf32>, vector<6x10xf32> -> vector<6x256xf32>
    %134 = arith.maximumf %127, %133 : vector<6x256xf32>
    %cst_161 = arith.constant 0.000000e+00 : f32
    %135 = vector.broadcast %cst_161 : f32 to vector<6x256xf32>
    %136 = arith.maximumf %134, %135 : vector<6x256xf32>
    %137 = arith.truncf %136 : vector<6x256xf32> to vector<6x256xbf16>
    %cst_162 = arith.constant 0.000000e+00 : f32
    %138 = vector.broadcast %cst_162 : f32 to vector<6x10xf32>
    %139 = vector.extract_strided_slice %130 {offsets = [0, 10], sizes = [6, 246], strides = [1, 1]} : vector<6x256xf32> to vector<6x246xf32>
    %140 = tpu.concatenate %139, %138 in 1 : vector<6x246xf32>, vector<6x10xf32> -> vector<6x256xf32>
    %141 = arith.maximumf %130, %140 : vector<6x256xf32>
    %cst_163 = arith.constant 0.000000e+00 : f32
    %142 = vector.broadcast %cst_163 : f32 to vector<6x256xf32>
    %143 = arith.maximumf %141, %142 : vector<6x256xf32>
    %144 = arith.truncf %143 : vector<6x256xf32> to vector<6x256xbf16>
    %145 = vector.extract_strided_slice %137 {offsets = [0, 0], sizes = [4, 256], strides = [1, 1]} : vector<6x256xbf16> to vector<4x256xbf16>
    %146 = vector.extract_strided_slice %144 {offsets = [0, 0], sizes = [4, 256], strides = [1, 1]} : vector<6x256xbf16> to vector<4x256xbf16>
    %147 = vector.extract_strided_slice %137 {offsets = [1, 0], sizes = [4, 256], strides = [1, 1]} : vector<6x256xbf16> to vector<4x256xbf16>
    %148 = vector.extract_strided_slice %144 {offsets = [1, 0], sizes = [4, 256], strides = [1, 1]} : vector<6x256xbf16> to vector<4x256xbf16>
    %149 = vector.extract_strided_slice %137 {offsets = [2, 0], sizes = [4, 256], strides = [1, 1]} : vector<6x256xbf16> to vector<4x256xbf16>
    %150 = tpu.concatenate %145, %146, %147, %148, %149 in 1 : vector<4x256xbf16>, vector<4x256xbf16>, vector<4x256xbf16>, vector<4x256xbf16>, vector<4x256xbf16> -> vector<4x1280xbf16>
    %c0_164 = arith.constant 0 : index
    %c0_165 = arith.constant 0 : index
    %151 = vector.load %arg4[%c0_164, %c0_165] : memref<1280x256xbf16, #tpu.memory_space<vmem>>, vector<1280x256xbf16>
    %cst_166 = arith.constant dense<0.000000e+00> : vector<4x256xf32>
    %152 = tpu.matmul %150, %151, %cst_166 {dimension_numbers = #tpu.dot_dimension_numbers<[1], [0], [0], [1], [0, 0, 1, 1], [], []>} : vector<4x1280xbf16>, vector<1280x256xbf16>, vector<4x256xf32> -> vector<4x256xf32>
    %153 = vector.extract_strided_slice %144 {offsets = [0, 0], sizes = [4, 256], strides = [1, 1]} : vector<6x256xbf16> to vector<4x256xbf16>
    %154 = vector.extract_strided_slice %137 {offsets = [1, 0], sizes = [4, 256], strides = [1, 1]} : vector<6x256xbf16> to vector<4x256xbf16>
    %155 = vector.extract_strided_slice %144 {offsets = [1, 0], sizes = [4, 256], strides = [1, 1]} : vector<6x256xbf16> to vector<4x256xbf16>
    %156 = vector.extract_strided_slice %137 {offsets = [2, 0], sizes = [4, 256], strides = [1, 1]} : vector<6x256xbf16> to vector<4x256xbf16>
    %157 = vector.extract_strided_slice %144 {offsets = [2, 0], sizes = [4, 256], strides = [1, 1]} : vector<6x256xbf16> to vector<4x256xbf16>
    %158 = tpu.concatenate %153, %154, %155, %156, %157 in 1 : vector<4x256xbf16>, vector<4x256xbf16>, vector<4x256xbf16>, vector<4x256xbf16>, vector<4x256xbf16> -> vector<4x1280xbf16>
    %c0_167 = arith.constant 0 : index
    %c0_168 = arith.constant 0 : index
    %159 = vector.load %arg4[%c0_167, %c0_168] : memref<1280x256xbf16, #tpu.memory_space<vmem>>, vector<1280x256xbf16>
    %cst_169 = arith.constant dense<0.000000e+00> : vector<4x256xf32>
    %160 = tpu.matmul %158, %159, %cst_169 {dimension_numbers = #tpu.dot_dimension_numbers<[1], [0], [0], [1], [0, 0, 1, 1], [], []>} : vector<4x1280xbf16>, vector<1280x256xbf16>, vector<4x256xf32> -> vector<4x256xf32>
    %161 = arith.maximumf %152, %160 : vector<4x256xf32>
    %c0_170 = arith.constant 0 : index
    %c0_171 = arith.constant 0 : index
    %162 = vector.load %arg5[%c0_170, %c0_171] : memref<1x256xf32, #tpu.memory_space<vmem>>, vector<1x256xf32>
    %163 = vector.broadcast %162 : vector<1x256xf32> to vector<4x256xf32>
    %164 = arith.addf %161, %163 : vector<4x256xf32>
    %cst_172 = arith.constant 0.000000e+00 : f32
    %165 = vector.broadcast %cst_172 : f32 to vector<4x20xf32>
    %166 = vector.extract_strided_slice %164 {offsets = [0, 20], sizes = [4, 236], strides = [1, 1]} : vector<4x256xf32> to vector<4x236xf32>
    %167 = tpu.concatenate %166, %165 in 1 : vector<4x236xf32>, vector<4x20xf32> -> vector<4x256xf32>
    %168 = arith.maximumf %164, %167 : vector<4x256xf32>
    %cst_173 = arith.constant 0.000000e+00 : f32
    %169 = vector.broadcast %cst_173 : f32 to vector<4x256xf32>
    %170 = arith.maximumf %168, %169 : vector<4x256xf32>
    %171 = arith.truncf %170 : vector<4x256xf32> to vector<4x256xbf16>
    %172 = vector.extract_strided_slice %171 {offsets = [0, 0], sizes = [1, 256], strides = [1, 1]} : vector<4x256xbf16> to vector<1x256xbf16>
    %173 = vector.extract_strided_slice %171 {offsets = [1, 0], sizes = [1, 256], strides = [1, 1]} : vector<4x256xbf16> to vector<1x256xbf16>
    %174 = vector.extract_strided_slice %171 {offsets = [2, 0], sizes = [1, 256], strides = [1, 1]} : vector<4x256xbf16> to vector<1x256xbf16>
    %175 = vector.extract_strided_slice %171 {offsets = [3, 0], sizes = [1, 256], strides = [1, 1]} : vector<4x256xbf16> to vector<1x256xbf16>
    %176 = tpu.concatenate %172, %173, %174, %175 in 1 : vector<1x256xbf16>, vector<1x256xbf16>, vector<1x256xbf16>, vector<1x256xbf16> -> vector<1x1024xbf16>
    %c0_174 = arith.constant 0 : index
    %c0_175 = arith.constant 0 : index
    %177 = vector.load %arg6[%c0_174, %c0_175] : memref<1024x128xbf16, #tpu.memory_space<vmem>>, vector<1024x128xbf16>
    %cst_176 = arith.constant dense<0.000000e+00> : vector<1x128xf32>
    %178 = tpu.matmul %176, %177, %cst_176 {dimension_numbers = #tpu.dot_dimension_numbers<[1], [0], [0], [1], [0, 0, 1, 1], [], []>} : vector<1x1024xbf16>, vector<1024x128xbf16>, vector<1x128xf32> -> vector<1x128xf32>
    %c0_177 = arith.constant 0 : index
    %c0_178 = arith.constant 0 : index
    %179 = vector.load %arg7[%c0_177, %c0_178] : memref<1x128xf32, #tpu.memory_space<vmem>>, vector<1x128xf32>
    %180 = arith.addf %178, %179 : vector<1x128xf32>
    %cst_179 = arith.constant 0.000000e+00 : f32
    %181 = vector.broadcast %cst_179 : f32 to vector<1x128xf32>
    %182 = arith.maximumf %180, %181 : vector<1x128xf32>
    %183 = arith.truncf %182 : vector<1x128xf32> to vector<1x128xbf16>
    %c0_180 = arith.constant 0 : index
    %c0_181 = arith.constant 0 : index
    %184 = vector.load %arg8[%c0_180, %c0_181] : memref<128x128xbf16, #tpu.memory_space<vmem>>, vector<128x128xbf16>
    %cst_182 = arith.constant dense<0.000000e+00> : vector<1x128xf32>
    %185 = tpu.matmul %183, %184, %cst_182 {dimension_numbers = #tpu.dot_dimension_numbers<[1], [0], [0], [1], [0, 0, 1, 1], [], []>} : vector<1x128xbf16>, vector<128x128xbf16>, vector<1x128xf32> -> vector<1x128xf32>
    %c0_183 = arith.constant 0 : index
    %c0_184 = arith.constant 0 : index
    %186 = vector.load %arg9[%c0_183, %c0_184] : memref<1x128xf32, #tpu.memory_space<vmem>>, vector<1x128xf32>
    %187 = arith.addf %185, %186 : vector<1x128xf32>
    %188 = tpu.iota {dimensions = array<i32: 1>} : vector<1x128xi32>
    %c10_i32 = arith.constant 10 : i32
    %189 = vector.broadcast %c10_i32 : i32 to vector<1x128xi32>
    %190 = arith.cmpi slt, %188, %189 : vector<1x128xi32>
    %cst_185 = arith.constant 0xFF800000 : f32
    %191 = vector.broadcast %cst_185 : f32 to vector<1x128xf32>
    %192 = arith.select %190, %187, %191 : vector<1x128xi1>, vector<1x128xf32>
    %cst_186 = arith.constant dense<0xFF800000> : vector<1xf32>
    %193 = vector.multi_reduction <maximumf>, %192, %cst_186 [1] : vector<1x128xf32> to vector<1xf32>
    %194 = vector.shape_cast %193 : vector<1xf32> to vector<1x1xf32>
    %195 = vector.broadcast %194 : vector<1x1xf32> to vector<1x128xf32>
    %196 = arith.subf %192, %195 : vector<1x128xf32>
    %197 = math.exp %196 : vector<1x128xf32>
    %cst_187 = arith.constant dense<0.000000e+00> : vector<1xf32>
    %198 = vector.multi_reduction <add>, %197, %cst_187 [1] : vector<1x128xf32> to vector<1xf32>
    %199 = vector.shape_cast %198 : vector<1xf32> to vector<1x1xf32>
    %200 = math.log %199 : vector<1x1xf32>
    %201 = arith.addf %200, %194 : vector<1x1xf32>
    %202 = vector.broadcast %201 : vector<1x1xf32> to vector<1x128xf32>
    %203 = arith.subf %187, %202 : vector<1x128xf32>
    %c0_188 = arith.constant 0 : index
    %c0_189 = arith.constant 0 : index
    %c0_190 = arith.constant 0 : index
    %204 = vector.load %arg10[%c0_188, %c0_189, %c0_190] : memref<1x1x128xf32, #tpu.memory_space<vmem>>, vector<1x1x128xf32>
    %205 = vector.shape_cast %204 : vector<1x1x128xf32> to vector<1x128xf32>
    %206 = vector.shape_cast %203 : vector<1x128xf32> to vector<1x1x128xf32>
    tpu.vector_store %arg10[%c0_188, %c0_189, %c0_190], %206 {strides = array<i32>} : memref<1x1x128xf32, #tpu.memory_space<vmem>>, vector<1x1x128xf32>,
    return
  }
  func.func @transform_0(%arg0: i32) -> (i32, i32, i32, i32) {
    %c0_i32 = arith.constant 0 : i32
    %c0_i32_0 = arith.constant 0 : i32
    %c0_i32_1 = arith.constant 0 : i32
    %c0_i32_2 = arith.constant 0 : i32
    return %arg0, %c0_i32, %c0_i32_0, %c0_i32_1 : i32, i32, i32, i32
  }
  func.func @transform_1(%arg0: i32) -> (i32, i32, i32) {
    %c0_i32 = arith.constant 0 : i32
    %c0_i32_0 = arith.constant 0 : i32
    %c0_i32_1 = arith.constant 0 : i32
    %c0_i32_2 = arith.constant 0 : i32
    return %c0_i32, %c0_i32_0, %c0_i32_1 : i32, i32, i32
  }
  func.func @transform_2(%arg0: i32) -> (i32, i32) {
    %c0_i32 = arith.constant 0 : i32
    %c0_i32_0 = arith.constant 0 : i32
    %c0_i32_1 = arith.constant 0 : i32
    return %c0_i32, %c0_i32_0 : i32, i32
  }
  func.func @transform_3(%arg0: i32) -> (i32, i32) {
    %c0_i32 = arith.constant 0 : i32
    %c0_i32_0 = arith.constant 0 : i32
    %c0_i32_1 = arith.constant 0 : i32
    return %c0_i32, %c0_i32_0 : i32, i32
  }
  func.func @transform_4(%arg0: i32) -> (i32, i32) {
    %c0_i32 = arith.constant 0 : i32
    %c0_i32_0 = arith.constant 0 : i32
    %c0_i32_1 = arith.constant 0 : i32
    return %c0_i32, %c0_i32_0 : i32, i32
  }
  func.func @transform_5(%arg0: i32) -> (i32, i32) {
    %c0_i32 = arith.constant 0 : i32
    %c0_i32_0 = arith.constant 0 : i32
    %c0_i32_1 = arith.constant 0 : i32
    return %c0_i32, %c0_i32_0 : i32, i32
  }
  func.func @transform_6(%arg0: i32) -> (i32, i32) {
    %c0_i32 = arith.constant 0 : i32
    %c0_i32_0 = arith.constant 0 : i32
    %c0_i32_1 = arith.constant 0 : i32
    return %c0_i32, %c0_i32_0 : i32, i32
  }
  func.func @transform_7(%arg0: i32) -> (i32, i32) {
    %c0_i32 = arith.constant 0 : i32
    %c0_i32_0 = arith.constant 0 : i32
    %c0_i32_1 = arith.constant 0 : i32
    return %c0_i32, %c0_i32_0 : i32, i32
  }
  func.func @transform_8(%arg0: i32) -> (i32, i32) {
    %c0_i32 = arith.constant 0 : i32
    %c0_i32_0 = arith.constant 0 : i32
    %c0_i32_1 = arith.constant 0 : i32
    return %c0_i32, %c0_i32_0 : i32, i32
  }
  func.func @transform_9(%arg0: i32) -> (i32, i32, i32) {
    %c0_i32 = arith.constant 0 : i32
    %c0_i32_0 = arith.constant 0 : i32
    %c0_i32_1 = arith.constant 0 : i32
    return %arg0, %c0_i32, %c0_i32_0 : i32, i32, i32
  }
}

</mosaic_0001>

<bundles_post_ra>
// kernel: net_forward.1
= control target key start
LH: loop header
LB: loop body
LE: loop exit
PB: predicated region body
PF: predicated region fallthrough
CT: control target
= control target key end

     0   :  { %14 = vsyncpa [#allocation3], 0  ;;  %s5942_s0 = inlined_call_operand.vmem [shape: bf16[2,4,7,32], index: 0, kind: input, shape index: {}]   ;;  %s5943_s1 = inlined_call_operand.vmem [shape: bf16[5,32,256], index: 1, kind: input, shape index: {}]   ;;  %s5944_s2 = inlined_call_operand.vmem [shape: f32[1,256], index: 2, kind: input, shape index: {}]   ;;  %s5945_s3 = inlined_call_operand.vmem [shape: bf16[1280,256], index: 3, kind: input, shape index: {}]   ;;  %s5946_s4 = inlined_call_operand.vmem [shape: f32[1,256], index: 4, kind: input, shape index: {}]   ;;  %s5947_s5 = inlined_call_operand.vmem [shape: bf16[1024,128], index: 5, kind: input, shape index: {}]   ;;  %s5948_s6 = inlined_call_operand.vmem [shape: f32[1,128], index: 6, kind: input, shape index: {}]   ;;  %s5949_s7 = inlined_call_operand.vmem [shape: bf16[128,128], index: 7, kind: input, shape index: {}]   ;;  %s5950_s8 = inlined_call_operand.vmem [shape: f32[1,128], index: 8, kind: input, shape index: {}]   ;;  %s5951_s9 = inlined_call_operand.hbm [shape: f32[2,1,128], index: 9, kind: output, shape index: {}]  }
   0x1   :  { %16 = vsyncpa [#allocation3 + $0x1], 0  ;;  %s4808_s30 = smov 0   ;;  %s4810_s10 = smov 0  }
   0x2   :  { %s4812_s11 = smov 0   ;;  %s4814_s12 = smov 0  }
   0x3 LB: > { %s4829_s13 = sadd.s32 4294967295, %s4750_s12   ;;  %s3760_s14 = sadd.s32 4294967294, %s4750_s12   ;;  %s4750_s12 = sphi %s4814_s12, %s5957_s12   ;;  %s4746_s11 = sphi %s4812_s11, %s5956_s11   ;;  %s4742_s10 = sphi %s4810_s10, %s5955_s10   ;;  %s4738_s30 = sphi %s4808_s30, %s5954_s30  }
   0x4   : > { %s4833_s15 = sadd.s32 1, %s4750_s12   ;;  %s223_s16 = sadd.s32 1, %s4746_s11 }
   0x5   : > { %s220_s17 = ssub.s32 %s4750_s12, %s4833_s15  ;;  %p233_p0 = scmp.ne.s32.totalorder %s4746_s11, %s4742_s10 }
   0x6   : > { %p221_p1 = scmp.eq.s32.totalorder %s220_s17, 0  ;;  %p234_p2 = scmp.eq.s32.totalorder %s4829_s13, 1 }
   0x7   : > { %p239_p3 = scmp.ne.s32.totalorder %s4742_s10, %s4738_s30  ;;  %p240_p4 = scmp.eq.s32.totalorder %s3760_s14, 1 }
   0x8   : > { %s4844_s18 = scalar_select %p221_p1, %s4746_s11, %s223_s16  }
   0x9   : > { %p4846_p5 = por %p234_p2, %p233_p0  ;;  %p4850_p6 = por %p240_p4, %p239_p3 }
   0xa   : > { %p3763_p7 = scmp.ge.s32.totalorder %s4750_s12, 1  ;;  %p290_p8 = scmp.lt.s32.totalorder %s4750_s12, 3 }
   0xc   : > { %p291_p9 = pnand %p3763_p7, %p290_p8 }
   0xd   : > { %v4859_v0 = vld [vmem:[%s5943_s1 + $0x24] ss:$8 sps:$4 sm:$0xff] (!%p291_p9)   ;;  %p325_p10 = scmp.lt.s32.totalorder (!%p291_p9), %s4829_s13, 1  ;;  %v4752_v2 = vmov (!%p291_p9), 0   ;;  %v4873_v3 = vld [vmem:[%s5943_s1 + $0x20] ss:$8 sps:$4 sm:$0xff] (!%p291_p9)  }
   0xe   : > { %294 = sbr.rel (%p291_p9) target bundleno = 1900 (0x76c), region = 56  ;;  %v4865_v1 = vld [vmem:[%s5943_s1 + $0x44] ss:$8 sps:$4 sm:$0xff] (!%p291_p9)   ;;  %399 = vmatprep.mubr.bf16.mxu1 (!%p291_p9), %v4752_v2  ;;  %534 = vmatprep.mubr.bf16.mxu0 (!%p291_p9), %v4752_v2  ;;  %v4878_v4 = vld [vmem:[%s5943_s1 + $0x40] ss:$8 sps:$4 sm:$0xff] (!%p291_p9)   ;;  %vm363_vm0 = vcmask (!%p291_p9), 261120  }
   0xf   : > { %367 = vmatprep.subr.bf16.mxu1 (!%p291_p9), %v4859_v0  ;;  %502 = vmatprep.subr.bf16.mxu0 (!%p291_p9), %v4865_v1  ;;  %v4885_v5 = vld [vmem:[%s5943_s1 + $0x34] ss:$8 sps:$4 sm:$0xff] (!%p291_p9)   ;;  %v4897_v7 = vld [vmem:[%s5943_s1 + $0x30] ss:$8 sps:$4 sm:$0xff] (!%p291_p9)   ;;  %v4915_v10 = vld [vmem:[%s5943_s1 + $0x4] ss:$8 sps:$4 sm:$0xff] (!%p291_p9)  }
  0x10   : > { %368 = vmatpush1.bf16.msra.mxu1 (!%p291_p9), %v4873_v3  ;;  %503 = vmatpush1.bf16.msra.mxu0 (!%p291_p9), %v4878_v4  ;;  %v4892_v6 = vld [vmem:[%s5943_s1 + $0x54] ss:$8 sps:$4 sm:$0xff] (!%p291_p9)   ;;  %v4903_v8 = vld [vmem:[%s5943_s1 + $0x50] ss:$8 sps:$4 sm:$0xff] (!%p291_p9)   ;;  %v4923_v12 = vld [vmem:[%s5943_s1] ss:$8 sps:$4 sm:$0xff] (!%p291_p9)  }
  0x11   : > { %369 = vmatprep.subr.bf16.mxu1 (!%p291_p9), %v4885_v5  ;;  %504 = vmatprep.subr.bf16.mxu0 (!%p291_p9), %v4892_v6  ;;  %v4930_v13 = vld [vmem:[%s5943_s1 + $0x64] ss:$8 sps:$4 sm:$0xff] (!%p291_p9)   ;;  %v4935_v14 = vld [vmem:[%s5943_s1 + $0x60] ss:$8 sps:$4 sm:$0xff] (!%p291_p9)   ;;  %v4941_v15 = vld [vmem:[%s5943_s1 + $0x14] ss:$8 sps:$4 sm:$0xff] (!%p291_p9)  }
  0x12   : > { %v4947_v16 = vld [vmem:[%s5943_s1 + $0x74] ss:$8 sps:$4 sm:$0xff] (!%p291_p9)   ;;  %v4955_v17 = vld [vmem:[%s5943_s1 + $0x10] ss:$8 sps:$4 sm:$0xff] (!%p291_p9)   ;;  %v4969_v19 = vld [vmem:[%s5943_s1 + $0x84] ss:$8 sps:$4 sm:$0xff] (!%p291_p9)  }
  0x13   : > { %v4962_v18 = vld [vmem:[%s5943_s1 + $0x70] ss:$8 sps:$4 sm:$0xff] (!%p291_p9)   ;;  %v4984_v22 = vld [vmem:[%s5943_s1 + $0x80] ss:$8 sps:$4 sm:$0xff] (!%p291_p9)   ;;  %v4990_v24 = vld [vmem:[%s5943_s1 + $0x94] ss:$8 sps:$4 sm:$0xff] (!%p291_p9)  }
  0x14   : > { %370 = vmatpush1.bf16.msra.mxu1 (!%p291_p9), %v4897_v7  ;;  %505 = vmatpush1.bf16.msra.mxu0 (!%p291_p9), %v4903_v8  ;;  %v4995_v25 = vld [vmem:[%s5943_s1 + $0x90] ss:$8 sps:$4 sm:$0xff] (!%p291_p9)   ;;  %v4372_v45 = vld [vmem:[%s5945_s3] ss:$8 sps:$4 sm:$0xff] (!%p291_p9)   ;;  %v4374_v46 = vld [vmem:[%s5945_s3 + $0x4] ss:$8 sps:$4 sm:$0xff] (!%p291_p9)  }
  0x15   : > { %s326_s29 = scalar_select %p325_p10, %s4829_s13, 1  ;;  %431 = vmatprep.subr.bf16.mxu1 %v4915_v10  ;;  %575 = vmatprep.subr.bf16.mxu0 %v4930_v13  ;;  %v4377_v47 = vld [vmem:[%s5945_s3 + $0x14] ss:$8 sps:$4 sm:$0xff]   ;;  %v4375_v48 = vld [vmem:[%s5945_s3 + $0x10] ss:$8 sps:$4 sm:$0xff]   ;;  %vm1401_vm1 = vcmask 965632  }
  0x16   : > { %v4380_v50 = vld [vmem:[%s5945_s3 + $0x24] ss:$8 sps:$4 sm:$0xff]   ;;  %v4378_v54 = vld [vmem:[%s5945_s3 + $0x20] ss:$8 sps:$4 sm:$0xff]   ;;  %v4383_v55 = vld [vmem:[%s5945_s3 + $0x34] ss:$8 sps:$4 sm:$0xff]  }
  0x17   : > { %s4067_s24 = sshll.u32 %s326_s29, 4  ;;  %v4381_v56 = vld [vmem:[%s5945_s3 + $0x30] ss:$8 sps:$4 sm:$0xff]   ;;  %v4386_v57 = vld [vmem:[%s5945_s3 + $0x44] ss:$8 sps:$4 sm:$0xff]   ;;  %s4753_s27 = smov 118  }
  0x18   : > { %s4908_s14 = scalar_lea.vmem %s5942_s0, %s4067_s24  ;;  %v4384_v58 = vld [vmem:[%s5945_s3 + $0x40] ss:$8 sps:$4 sm:$0xff]   ;;  %v4389_v60 = vld [vmem:[%s5945_s3 + $0x54] ss:$8 sps:$4 sm:$0xff]   ;;  %s4754_s28 = smov 108   ;;  %vm2864_vm2 = vcmask 883712  }
  0x19   : > { %v3766_v9 = vld [vmem:[%s4908_s14 + $0x4] sm:$0x7]  ;;  %v4918_v11 = vld [vmem:[%s4908_s14 + $0x8] sm:$0x7]  ;;  %v331_v20 = vld [vmem:[%s4908_s14] sm:$0x7] }
  0x1a   : > { %3775 = vmatmul.mubr.msk.bf16.vlgmr.msra.gmra.mrb[0].mxu1 %vm363_vm0, %v3766_v9  ;;  %3790 = vmatmul.mubr.msk.bf16.vlgmr.msra.gmra.mrb[0].mxu0 %vm363_vm0, %v4918_v11  ;;  %v4979_v21 = vld [vmem:[%s4908_s14 + $0xc] sm:$0x7]  ;;  %v4368_v23 = vld [vmem:[%s4908_s14] ss:$0 sps:$4 sm:$0xff]   ;;  %v4369_v30 = vld [vmem:[%s4908_s14 + $0x4] ss:$0 sps:$4 sm:$0xff]  }
  0x1b   : > { %432 = vmatpush1.bf16.msra.mxu1 %v4923_v12  ;;  %576 = vmatpush1.bf16.msra.mxu0 %v4935_v14  ;;  %v630_v26 = vshll.u32 %v4368_v23, 16  ;;  %v628_v27 = vshrl.u32 %v4368_v23, 16  ;;  %v4370_v31 = vld [vmem:[%s4908_s14 + $0x8] ss:$0 sps:$4 sm:$0xff]   ;;  %v875_v32 = vshll.u32 %v4369_v30, 16  ;;  %v873_v34 = vshrl.u32 %v4369_v30, 16 }
  0x1c   : > { %433 = vmatprep.subr.bf16.mxu1 %v4941_v15  ;;  %577 = vmatprep.subr.bf16.mxu0 %v4947_v16  ;;  %v1100_v33 = vshll.u32 %v4370_v31, 16  ;;  %v1098_v35 = vshrl.u32 %v4370_v31, 16  ;;  %v4371_v40 = vld [vmem:[%s4908_s14 + $0xc] ss:$0 sps:$4 sm:$0xff]   ;;  %v4411_v30 = vld [vmem:[%s5945_s3 + $0xd0] ss:$8 sps:$4 sm:$0xff]  }
  0x1d   : > { %463 = vmatprep.mubr.bf16.mxu1 %v4752_v2  ;;  %607 = vmatprep.mubr.bf16.mxu0 %v4752_v2  ;;  %v632_v28 = vrot.slane %v630_v26, 1  ;;  %v877_v36 = vrot.slane %v875_v32, 1  ;;  %v1325_v41 = vshll.u32 %v4371_v40, 16  ;;  %v1323_v42 = vshrl.u32 %v4371_v40, 16  ;;  %v1375_v32 = vld [vmem:[%s5944_s2] sm:$0x3] }
  0x1e   : > { %v1102_v37 = vrot.slane %v1100_v33, 1  ;;  %v4416_v33 = vld [vmem:[%s5945_s3 + $0xe4] ss:$8 sps:$4 sm:$0xff]   ;;  %v4419_v40 = vld [vmem:[%s5945_s3 + $0xf4] ss:$8 sps:$4 sm:$0xff]   ;;  %vm4756_vm3 = vmmov 0  }
  0x1f   : > { %434 = vmatpush1.bf16.msra.mxu1 %v4955_v17  ;;  %578 = vmatpush1.bf16.msra.mxu0 %v4962_v18  ;;  %v5012_v29 = vor.u32 %v632_v28, %v628_v27  ;;  %v878_v38 = vor.u32 %v877_v36, %v873_v34  ;;  %v1327_v43 = vrot.slane %v1325_v41, 1  ;;  %v1379_v27 = vlaneseq  ;;  %v4414_v34 = vld [vmem:[%s5945_s3 + $0xe0] ss:$8 sps:$4 sm:$0xff]   ;;  %s323_s25 = sand.u32 1, %s4742_s10   ;;  %s4064_s26 = sshll.u32 %s4829_s13, 4 }
  0x20   : > { %700 = vmatprep.subr.bf16.mxu1 %v4859_v0  ;;  %657 = vmatprep.subr.bf16.mxu0 %v4969_v19  ;;  %v1103_v39 = vor.u32 %v1102_v37, %v1098_v35  ;;  %vm3677_vm5 = vcmask 1040384   ;;  %s5900_s29 = scalar_lea.hbm %s5951_s9, %s4064_s26  ;;  %s3693_s21 = scalar_lea.sflag [#allocation3], %s323_s25 }
  0x21   : > { %v1328_v44 = vor.u32 %v1327_v43, %v1323_v42  ;;  %v5193_v28 = vshrl.u32 %v1379_v27, 7  ;;  %v4417_v43 = vld [vmem:[%s5945_s3 + $0xf0] ss:$8 sps:$4 sm:$0xff]   ;;  %s4757_s13 = smov [#allocation2]  }
  0x22   : > { %s4692_s22 = sshll.u32 %s4757_s13, 4  ;;  %s4693_s22 = int_to_ptr.vmem [resolvable:$false] %s4692_s22 }
  0x23   : > { %v1385_v31 = vsub.s32 1, %v5193_v28  ;;  %v1381_v35 = vsub.s32 0, %v5193_v28  ;;  %s4694_s23 = scalar_lea.vmem %s4693_s22, 32 }
  0x25   : > { %v1386_v36 = vrot.slane %v1375_v32, %v1385_v31 }
  0x26   : > { %3780 = vmatmul.mubr.msk.bf16.vlgmr.msra.gmra.mrb[0].mxu1 %vm363_vm0, %v331_v20  ;;  %3800 = vmatmul.mubr.msk.bf16.vlgmr.msra.gmra.mrb[0].mxu0 %vm363_vm0, %v4979_v21 }
  0x27   : > { %701 = vmatpush1.bf16.msra.mxu1 %v4873_v3  ;;  %658 = vmatpush1.bf16.msra.mxu0 %v4984_v22 }
  0x28   : > { %702 = vmatprep.subr.bf16.mxu1 %v4885_v5  ;;  %732 = vmatprep.mubr.bf16.mxu1 %v4752_v2 }
  0x29   : > { %659 = vmatprep.subr.bf16.mxu0 %v4990_v24  ;;  %689 = vmatprep.mubr.bf16.mxu0 %v4752_v2 }
  0x2b   : > { %703 = vmatpush1.bf16.msra.mxu1 %v4897_v7  ;;  %660 = vmatpush1.bf16.msra.mxu0 %v4995_v25 }
  0x2c   : > { %741 = vmatprep.subr.bf16.mxu1 %v4915_v10  ;;  %925 = vmatprep.subr.bf16.mxu0 %v4859_v0 }
  0x2e   : > { %3811 = vmatmul.mubr.msk.bf16.vlgmr.msra.gmra.mrb[4].mxu1 %vm363_vm0, %v4918_v11 }
  0x2f   : > { %742 = vmatpush1.bf16.msra.mxu1 %v4923_v12  ;;  %773 = vmatprep.mubr.bf16.mxu1 %v4752_v2 }
  0x30   : > { %743 = vmatprep.subr.bf16.mxu1 %v4941_v15 }
  0x32   : > { %3810 = vmatmul.mubr.msk.bf16.vlgmr.msra.gmra.mrb[0].mxu0 %vm363_vm0, %v5012_v29 }
  0x33   : > { %926 = vmatpush1.bf16.msra.mxu0 %v4873_v3  ;;  %744 = vmatpush1.bf16.msra.mxu1 %v4955_v17 }
  0x34   : > { %927 = vmatprep.subr.bf16.mxu0 %v4885_v5  ;;  %957 = vmatprep.mubr.bf16.mxu0 %v4752_v2 }
  0x35   : > { %782 = vmatprep.subr.bf16.mxu1 %v4865_v1 }
  0x37   : > { %928 = vmatpush1.bf16.msra.mxu0 %v4897_v7 }
  0x38   : > { %966 = vmatprep.subr.bf16.mxu0 %v4915_v10 }
  0x3a   : > { %3812 = vmatmul.mubr.msk.bf16.vlgmr.msra.gmra.mrb[4].mxu1 %vm363_vm0, %v3766_v9  ;;  %3818 = vmatmul.mubr.msk.bf16.vlgmr.msra.gmra.mrb[4].mxu0 %vm363_vm0, %v4979_v21  ;;  %v4401_v9 = vld [vmem:[%s5945_s3 + $0x94] ss:$8 sps:$4 sm:$0xff]  }
  0x3b   : > { %783 = vmatpush1.bf16.msra.mxu1 %v4878_v4  ;;  %967 = vmatpush1.bf16.msra.mxu0 %v4923_v12 }
  0x3c   : > { %784 = vmatprep.subr.bf16.mxu1 %v4892_v6  ;;  %968 = vmatprep.subr.bf16.mxu0 %v4941_v15 }
  0x3d   : > { %814 = vmatprep.mubr.bf16.mxu1 %v4752_v2  ;;  %998 = vmatprep.mubr.bf16.mxu0 %v4752_v2 }
  0x3f   : > { %785 = vmatpush1.bf16.msra.mxu1 %v4903_v8  ;;  %969 = vmatpush1.bf16.msra.mxu0 %v4955_v17 }
  0x40   : > { %825 = vmatprep.subr.bf16.mxu1 %v4930_v13  ;;  %1007 = vmatprep.subr.bf16.mxu0 %v4865_v1 }
  0x46   : > { %3813 = vmatmul.mubr.msk.bf16.vlgmr.msra.gmra.mrb[4].mxu1 %vm363_vm0, %v4979_v21  ;;  %3819 = vmatmul.mubr.msk.bf16.vlgmr.msra.gmra.mrb[4].mxu0 %vm363_vm0, %v4918_v11  ;;  %v4404_v11 = vld [vmem:[%s5945_s3 + $0xa4] ss:$8 sps:$4 sm:$0xff]  }
  0x47   : > { %826 = vmatpush1.bf16.msra.mxu1 %v4935_v14  ;;  %1008 = vmatpush1.bf16.msra.mxu0 %v4878_v4 }
  0x48   : > { %827 = vmatprep.subr.bf16.mxu1 %v4947_v16  ;;  %1009 = vmatprep.subr.bf16.mxu0 %v4892_v6 }
  0x49   : > { %857 = vmatprep.mubr.bf16.mxu1 %v4752_v2  ;;  %1039 = vmatprep.mubr.bf16.mxu0 %v4752_v2 }
  0x4b   : > { %828 = vmatpush1.bf16.msra.mxu1 %v4962_v18  ;;  %1010 = vmatpush1.bf16.msra.mxu0 %v4903_v8 }
  0x4c   : > { %882 = vmatprep.subr.bf16.mxu1 %v4969_v19  ;;  %1050 = vmatprep.subr.bf16.mxu0 %v4930_v13 }
  0x52   : > { %3814 = vmatmul.mubr.msk.bf16.vlgmr.msra.gmra.mrb[4].mxu1 %vm363_vm0, %v5012_v29  ;;  %3820 = vmatmul.mubr.msk.bf16.vlgmr.msra.gmra.mrb[4].mxu0 %vm363_vm0, %v5012_v29 }
  0x53   : > { %883 = vmatpush1.bf16.msra.mxu1 %v4984_v22  ;;  %1051 = vmatpush1.bf16.msra.mxu0 %v4935_v14 }
  0x54   : > { %884 = vmatprep.subr.bf16.mxu1 %v4990_v24  ;;  %1052 = vmatprep.subr.bf16.mxu0 %v4947_v16 }
  0x55   : > { %914 = vmatprep.mubr.bf16.mxu1 %v4752_v2  ;;  %1082 = vmatprep.mubr.bf16.mxu0 %v4752_v2 }
  0x57   : > { %885 = vmatpush1.bf16.msra.mxu1 %v4995_v25  ;;  %1053 = vmatpush1.bf16.msra.mxu0 %v4962_v18 }
  0x58   : > { %1150 = vmatprep.subr.bf16.mxu1 %v4859_v0  ;;  %1107 = vmatprep.subr.bf16.mxu0 %v4969_v19 }
  0x5e   : > { %3817 = vmatmul.mubr.msk.bf16.vlgmr.msra.gmra.mrb[4].mxu1 %vm363_vm0, %v878_v38  ;;  %3821 = vmatmul.mubr.msk.bf16.vlgmr.msra.gmra.mrb[4].mxu0 %vm363_vm0, %v878_v38 }
  0x5f   : > { %1151 = vmatpush1.bf16.msra.mxu1 %v4873_v3  ;;  %1108 = vmatpush1.bf16.msra.mxu0 %v4984_v22  ;;  %v4392_v3 = vld [vmem:[%s5945_s3 + $0x64] ss:$8 sps:$4 sm:$0xff]  }
  0x60   : > { %1152 = vmatprep.subr.bf16.mxu1 %v4885_v5  ;;  %1182 = vmatprep.mubr.bf16.mxu1 %v4752_v2  ;;  %v4395_v5 = vld [vmem:[%s5945_s3 + $0x74] ss:$8 sps:$4 sm:$0xff]  }
  0x61   : > { %1109 = vmatprep.subr.bf16.mxu0 %v4990_v24  ;;  %1139 = vmatprep.mubr.bf16.mxu0 %v4752_v2 }
  0x63   : > { %1153 = vmatpush1.bf16.msra.mxu1 %v4897_v7  ;;  %1110 = vmatpush1.bf16.msra.mxu0 %v4995_v25  ;;  %v4398_v7 = vld [vmem:[%s5945_s3 + $0x84] ss:$8 sps:$4 sm:$0xff]  }
  0x64   : > { %1191 = vmatprep.subr.bf16.mxu1 %v4915_v10  ;;  %2426 = vmatprep.subr.bf16.mxu0 %v4374_v46  ;;  %v4399_v10 = vld [vmem:[%s5945_s3 + $0x90] ss:$8 sps:$4 sm:$0xff]  }
  0x66   : > { %3825 = vmatmul.mubr.msk.bf16.vlgmr.msra.gmra.mrb[8].mxu1 %vm363_vm0, %v5012_v29  ;;  %v4413_v29 = vld [vmem:[%s5945_s3 + $0xd4] ss:$8 sps:$4 sm:$0xff]  }
  0x67   : > { %1192 = vmatpush1.bf16.msra.mxu1 %v4923_v12  ;;  %1223 = vmatprep.mubr.bf16.mxu1 %v4752_v2  ;;  %v4402_v12 = vld [vmem:[%s5945_s3 + $0xa0] ss:$8 sps:$4 sm:$0xff]  }
  0x68   : > { %1193 = vmatprep.subr.bf16.mxu1 %v4941_v15  ;;  %v4410_v15 = vld [vmem:[%s5945_s3 + $0xc4] ss:$8 sps:$4 sm:$0xff]  }
  0x6a   : > { %3824 = vmatmul.mubr.msk.bf16.vlgmr.msra.gmra.mrb[4].mxu0 %vm363_vm0, %v1103_v39 }
  0x6b   : > { %1194 = vmatpush1.bf16.msra.mxu1 %v4955_v17  ;;  %2427 = vmatpush1.bf16.msra.mxu0 %v4372_v45 }
  0x6c   : > { %1232 = vmatprep.subr.bf16.mxu1 %v4865_v1  ;;  %2428 = vmatprep.subr.bf16.mxu0 %v4377_v47 }
  0x6f   : > { %2429 = vmatpush1.bf16.msra.mxu0 %v4375_v48 }
  0x70   : > { %2430 = vmatprep.subr.bf16.mxu0 %v4380_v50 }
  0x72   : > { %3826 = vmatmul.mubr.msk.bf16.vlgmr.msra.gmra.mrb[8].mxu1 %vm363_vm0, %v4979_v21 }
  0x73   : > { %1233 = vmatpush1.bf16.msra.mxu1 %v4878_v4  ;;  %1264 = vmatprep.mubr.bf16.mxu1 %v4752_v2  ;;  %v4390_v4 = vld [vmem:[%s5945_s3 + $0x60] ss:$8 sps:$4 sm:$0xff]  }
  0x74   : > { %1234 = vmatprep.subr.bf16.mxu1 %v4892_v6  ;;  %2431 = vmatpush1.bf16.msra.mxu0 %v4378_v54  ;;  %v4393_v6 = vld [vmem:[%s5945_s3 + $0x70] ss:$8 sps:$4 sm:$0xff]  }
  0x75   : > { %2432 = vmatprep.subr.bf16.mxu0 %v4383_v55 }
  0x77   : > { %1235 = vmatpush1.bf16.msra.mxu1 %v4903_v8  ;;  %v4396_v8 = vld [vmem:[%s5945_s3 + $0x80] ss:$8 sps:$4 sm:$0xff]  }
  0x78   : > { %1275 = vmatprep.subr.bf16.mxu1 %v4930_v13  ;;  %2433 = vmatpush1.bf16.msra.mxu0 %v4381_v56  ;;  %v4407_v13 = vld [vmem:[%s5945_s3 + $0xb4] ss:$8 sps:$4 sm:$0xff]  }
  0x79   : > { %2434 = vmatprep.subr.bf16.mxu0 %v4386_v57 }
  0x7c   : > { %2435 = vmatpush1.bf16.msra.mxu0 %v4384_v58 }
  0x7d   : > { %2436 = vmatprep.subr.bf16.mxu0 %v4389_v60 }
  0x7e   : > { %3827 = vmatmul.mubr.msk.bf16.vlgmr.msra.gmra.mrb[8].mxu1 %vm363_vm0, %v878_v38 }
  0x7f   : > { %1276 = vmatpush1.bf16.msra.mxu1 %v4935_v14  ;;  %1307 = vmatprep.mubr.bf16.mxu1 %v4752_v2  ;;  %v4405_v14 = vld [vmem:[%s5945_s3 + $0xb0] ss:$8 sps:$4 sm:$0xff]  }
  0x80   : > { %1277 = vmatprep.subr.bf16.mxu1 %v4947_v16  ;;  %v4408_v16 = vld [vmem:[%s5945_s3 + $0xc0] ss:$8 sps:$4 sm:$0xff]  }
  0x83   : > { %1278 = vmatpush1.bf16.msra.mxu1 %v4962_v18 }
  0x84   : > { %1332 = vmatprep.subr.bf16.mxu1 %v4969_v19 }
  0x8a   : > { %3828 = vmatmul.mubr.msk.bf16.vlgmr.msra.gmra.mrb[8].mxu1 %vm363_vm0, %v1103_v39 }
  0x8b   : > { %1333 = vmatpush1.bf16.msra.mxu1 %v4984_v22  ;;  %1364 = vmatprep.mubr.bf16.mxu1 %v4752_v2  ;;  %v4387_v2 = vld [vmem:[%s5945_s3 + $0x50] ss:$8 sps:$4 sm:$0xff]  }
  0x8c   : > { %1334 = vmatprep.subr.bf16.mxu1 %v4990_v24  ;;  %2437 = vmatpush1.bf16.msra.mxu0 %v4387_v2 }
  0x8d   : > { %2438 = vmatprep.subr.bf16.mxu0 %v4392_v3 }
  0x8f   : > { %1335 = vmatpush1.bf16.msra.mxu1 %v4995_v25 }
  0x90   : > { %2637 = vmatprep.subr.bf16.mxu1 %v4374_v46  ;;  %2439 = vmatpush1.bf16.msra.mxu0 %v4390_v4 }
  0x91   : > { %2440 = vmatprep.subr.bf16.mxu0 %v4395_v5 }
  0x94   : > { %2441 = vmatpush1.bf16.msra.mxu0 %v4393_v6 }
  0x95   : > { %2442 = vmatprep.subr.bf16.mxu0 %v4398_v7 }
  0x96   : > { %3831 = vmatmul.mubr.msk.bf16.vlgmr.msra.gmra.mrb[8].mxu1 %vm363_vm0, %v1328_v44 }
  0x97   : > { %2638 = vmatpush1.bf16.msra.mxu1 %v4372_v45  ;;  %v1382_v45 = vrot.slane %v1375_v32, %v1381_v35  ;;  %v4441_v32 = vld [vmem:[%s5945_s3 + $0x170] ss:$8 sps:$4 sm:$0xff]  }
  0x98   : > { %2639 = vmatprep.subr.bf16.mxu1 %v4377_v47  ;;  %2443 = vmatpush1.bf16.msra.mxu0 %v4396_v8 }
  0x99   : > { %2444 = vmatprep.subr.bf16.mxu0 %v4401_v9 }
  0x9b   : > { %2640 = vmatpush1.bf16.msra.mxu1 %v4375_v48  ;;  %v4422_v48 = vld [vmem:[%s5945_s3 + $0x104] ss:$8 sps:$4 sm:$0xff]  }
  0x9c   : > { %2641 = vmatprep.subr.bf16.mxu1 %v4380_v50  ;;  %2445 = vmatpush1.bf16.msra.mxu0 %v4399_v10 }
  0x9d   : > { %2446 = vmatprep.subr.bf16.mxu0 %v4404_v11 }
  0x9f   : > { %2642 = vmatpush1.bf16.msra.mxu1 %v4378_v54 }
  0xa0   : > { %2643 = vmatprep.subr.bf16.mxu1 %v4383_v55  ;;  %2447 = vmatpush1.bf16.msra.mxu0 %v4402_v12 }
  0xa1   : > { %2448 = vmatprep.subr.bf16.mxu0 %v4407_v13 }
  0xa3   : > { %2644 = vmatpush1.bf16.msra.mxu1 %v4381_v56 }
  0xa4   : > { %2645 = vmatprep.subr.bf16.mxu1 %v4386_v57  ;;  %2449 = vmatpush1.bf16.msra.mxu0 %v4405_v14 }
  0xa5   : > { %2450 = vmatprep.subr.bf16.mxu0 %v4410_v15 }
  0xa7   : > { %2646 = vmatpush1.bf16.msra.mxu1 %v4384_v58 }
  0xa8   : > { %2647 = vmatprep.subr.bf16.mxu1 %v4389_v60  ;;  %2451 = vmatpush1.bf16.msra.mxu0 %v4408_v16 }
  0xa9   : > { %2452 = vmatprep.subr.bf16.mxu0 %v4413_v29 }
  0xab   : > { %2648 = vmatpush1.bf16.msra.mxu1 %v4387_v2 }
  0xac   : > { %2649 = vmatprep.subr.bf16.mxu1 %v4392_v3  ;;  %2453 = vmatpush1.bf16.msra.mxu0 %v4411_v30 }
  0xad   : > { %2454 = vmatprep.subr.bf16.mxu0 %v4416_v33 }
  0xaf   : > { %2650 = vmatpush1.bf16.msra.mxu1 %v4390_v4 }
  0xb0   : > { %2651 = vmatprep.subr.bf16.mxu1 %v4395_v5  ;;  %2455 = vmatpush1.bf16.msra.mxu0 %v4414_v34 }
  0xb1   : > { %2456 = vmatprep.subr.bf16.mxu0 %v4419_v40 }
  0xb3   : > { %2652 = vmatpush1.bf16.msra.mxu1 %v4393_v6 }
  0xb4   : > { %2653 = vmatprep.subr.bf16.mxu1 %v4398_v7  ;;  %2457 = vmatpush1.bf16.msra.mxu0 %v4417_v43 }
  0xb5   : > { %2467 = vmatprep.subr.bf16.mxu0 %v4422_v48 }
  0xb7   : > { %2654 = vmatpush1.bf16.msra.mxu1 %v4396_v8 }
  0xb8   : > { %2655 = vmatprep.subr.bf16.mxu1 %v4401_v9 }
  0xbb   : > { %2656 = vmatpush1.bf16.msra.mxu1 %v4399_v10  ;;  %v4420_v10 = vld [vmem:[%s5945_s3 + $0x100] ss:$8 sps:$4 sm:$0xff]  }
  0xbc   : > { %2657 = vmatprep.subr.bf16.mxu1 %v4404_v11 }
  0xbf   : > { %2658 = vmatpush1.bf16.msra.mxu1 %v4402_v12 }
  0xc0   : > { %2659 = vmatprep.subr.bf16.mxu1 %v4407_v13 }
  0xc3   : > { %2660 = vmatpush1.bf16.msra.mxu1 %v4405_v14 }
  0xc4   : > { %2661 = vmatprep.subr.bf16.mxu1 %v4410_v15  ;;  %v4425_v15 = vld [vmem:[%s5945_s3 + $0x114] ss:$8 sps:$4 sm:$0xff]  }
  0xc7   : > { %2662 = vmatpush1.bf16.msra.mxu1 %v4408_v16 }
  0xc8   : > { %2663 = vmatprep.subr.bf16.mxu1 %v4413_v29  ;;  %v4438_v29 = vld [vmem:[%s5945_s3 + $0x160] ss:$8 sps:$4 sm:$0xff]  }
  0xcb   : > { %2664 = vmatpush1.bf16.msra.mxu1 %v4411_v30  ;;  %v4443_v30 = vld [vmem:[%s5945_s3 + $0x174] ss:$8 sps:$4 sm:$0xff]  }
  0xcc   : > { %2665 = vmatprep.subr.bf16.mxu1 %v4416_v33  ;;  %v4446_v33 = vld [vmem:[%s5945_s3 + $0x184] ss:$8 sps:$4 sm:$0xff]  }
  0xcf   : > { %2666 = vmatpush1.bf16.msra.mxu1 %v4414_v34  ;;  %v4444_v34 = vld [vmem:[%s5945_s3 + $0x180] ss:$8 sps:$4 sm:$0xff]  }
  0xd0   : > { %2667 = vmatprep.subr.bf16.mxu1 %v4419_v40  ;;  %v4455_v40 = vld [vmem:[%s5945_s3 + $0x1b4] ss:$8 sps:$4 sm:$0xff]  }
  0xd3   : > { %2668 = vmatpush1.bf16.msra.mxu1 %v4417_v43  ;;  %v4456_v43 = vld [vmem:[%s5945_s3 + $0x1c0] ss:$8 sps:$4 sm:$0xff]  }
  0xd4   : > { %2678 = vmatprep.subr.bf16.mxu1 %v4422_v48  ;;  %v4467_v48 = vld [vmem:[%s5945_s3 + $0x1f4] ss:$8 sps:$4 sm:$0xff]  }
  0xf9   : > { %v465_v49 = vpop.f32.mrb[0].mxu1 }
  0xfa   : > { %v467_v51 = vpop.f32.mrb[1].mxu1 }
  0xfb   : > { %v469_v52 = vpop.f32.mrb[2].mxu1 }
  0xfc   : > { %v470_v53 = vpop.f32.mrb[3].mxu1 }
 0x105   : > { %v691_v59 = vpop.f32.mrb[0].mxu0 }
 0x106   : > { %v5141_v61 = vadd.f32 %v691_v59, %v465_v49  ;;  %v693_v62 = vpop.f32.mrb[1].mxu0 }
 0x107   : > { %v5143_v63 = vadd.f32 %v693_v62, %v467_v51  ;;  %v695_v0 = vpop.f32.mrb[2].mxu0 }
 0x108   : > { %v696_v1 = vpop.f32.mrb[3].mxu0 }
 0x131   : > { %v916_v17 = vpop.f32.mrb[4].mxu1 }
 0x132   : > { %v1376_v18 = vmax.f32 %v5141_v61, %v916_v17  ;;  %v918_v19 = vpop.f32.mrb[5].mxu1  ;;  %v4423_v17 = vld [vmem:[%s5945_s3 + $0x110] ss:$8 sps:$4 sm:$0xff]  }
 0x133   : > { %v1377_v20 = vmax.f32 %v5143_v63, %v918_v19  ;;  %v920_v21 = vpop.f32.mrb[6].mxu1  ;;  %v4426_v19 = vld [vmem:[%s5945_s3 + $0x120] ss:$8 sps:$4 sm:$0xff]  }
 0x134   : > { %v921_v22 = vpop.f32.mrb[7].mxu1  ;;  %v1389_v51 = vadd.f32 %v1382_v45, %v1376_v18  ;;  %v4428_v18 = vld [vmem:[%s5945_s3 + $0x124] ss:$8 sps:$4 sm:$0xff]   ;;  %v4429_v21 = vld [vmem:[%s5945_s3 + $0x130] ss:$8 sps:$4 sm:$0xff]  }
 0x135   : > { %v1390_v46 = vadd.f32 %v1386_v36, %v1377_v20  ;;  %v4431_v20 = vld [vmem:[%s5945_s3 + $0x134] ss:$8 sps:$4 sm:$0xff]   ;;  %v4434_v22 = vld [vmem:[%s5945_s3 + $0x144] ss:$8 sps:$4 sm:$0xff]  }
 0x13d   : > { %v1141_v23 = vpop.f32.mrb[4].mxu0 }
 0x13e   : > { %v1143_v24 = vpop.f32.mrb[5].mxu0 }
 0x13f   : > { %v1145_v25 = vpop.f32.mrb[6].mxu0 }
 0x140   : > { %v1146_v26 = vpop.f32.mrb[7].mxu0  ;;  %v4435_v25 = vld [vmem:[%s5945_s3 + $0x150] ss:$8 sps:$4 sm:$0xff]  }
 0x141   : > { %v4440_v26 = vld [vmem:[%s5945_s3 + $0x164] ss:$8 sps:$4 sm:$0xff]  }
 0x169   : > { %v1366_v37 = vpop.f32.mrb[8].mxu1 }
 0x16a   : > { %v1391_v38 = vmax.f32 %v1141_v23, %v1366_v37  ;;  %v1368_v39 = vpop.f32.mrb[9].mxu1  ;;  %v4432_v23 = vld [vmem:[%s5945_s3 + $0x140] ss:$8 sps:$4 sm:$0xff]   ;;  %v4447_v37 = vld [vmem:[%s5945_s3 + $0x190] ss:$8 sps:$4 sm:$0xff]  }
 0x16b   : > { %v1392_v41 = vmax.f32 %v1143_v24, %v1368_v39  ;;  %v1370_v42 = vpop.f32.mrb[10].mxu1  ;;  %v4437_v24 = vld [vmem:[%s5945_s3 + $0x154] ss:$8 sps:$4 sm:$0xff]   ;;  %v4450_v39 = vld [vmem:[%s5945_s3 + $0x1a0] ss:$8 sps:$4 sm:$0xff]  }
 0x16c   : > { %v1371_v44 = vpop.f32.mrb[11].mxu1  ;;  %v1393_v49 = vadd.f32 %v1391_v38, %v1382_v45  ;;  %v4452_v38 = vld [vmem:[%s5945_s3 + $0x1a4] ss:$8 sps:$4 sm:$0xff]   ;;  %v4459_v45 = vld [vmem:[%s5945_s3 + $0x1d0] ss:$8 sps:$4 sm:$0xff]  }
 0x16d   : > { %v1394_v47 = vadd.f32 %v1392_v41, %v1386_v36  ;;  %v4449_v36 = vld [vmem:[%s5945_s3 + $0x194] ss:$8 sps:$4 sm:$0xff]   ;;  %v4453_v41 = vld [vmem:[%s5945_s3 + $0x1b0] ss:$8 sps:$4 sm:$0xff]   ;;  %v4458_v42 = vld [vmem:[%s5945_s3 + $0x1c4] ss:$8 sps:$4 sm:$0xff]  }
 0x16e   : > { %v4328_v52 = vpack.i.bf16 %v1393_v49, %v1389_v51  ;;  %v4461_v44 = vld [vmem:[%s5945_s3 + $0x1d4] ss:$8 sps:$4 sm:$0xff]  }
 0x16f   : > { %v4323_v50 = vpack.i.bf16 %v1394_v47, %v1390_v46 }
 0x171   : > { %4324 = vrot.lane.b32.xlu0 %v4323_v50, %s4753_s27 }
 0x175   : > { %4329 = vrot.lane.b32.xlu0 %v4328_v52, %s4753_s27  ;;  %v4470_v52 = vld [vmem:[%s5945_s3 + $0x204] ss:$8 sps:$4 sm:$0xff]   ;;  %s324_s27 = scalar_lea.vmem [#allocation2], %s323_s25 }
 0x1e3   : > { %v4325_v53 = vpop.permute.xlu0 %4324 }
 0x1e4   : > { %v4327_v54 = vunpack.i.h.bf16 %v4325_v53  ;;  %v4326_v55 = vunpack.i.l.bf16 %v4325_v53 }
 0x1e6   : > { %v1421_v56 = vsel %vm1401_vm1, %v4327_v54, 0.0  ;;  %v1405_v57 = vsel %vm1401_vm1, %v4326_v55, 0.0 }
 0x1e7   : > { %v1423_v58 = vmax.f32 %v1394_v47, %v1421_v56  ;;  %v1407_v59 = vmax.f32 %v1390_v46, %v1405_v57  ;;  %v4330_v60 = vpop.permute.xlu0 %4329  ;;  %v4464_v46 = vld [vmem:[%s5945_s3 + $0x1e4] ss:$8 sps:$4 sm:$0xff]   ;;  %v4462_v47 = vld [vmem:[%s5945_s3 + $0x1e0] ss:$8 sps:$4 sm:$0xff]  }
 0x1e8   : > { %v4332_v61 = vunpack.i.h.bf16 %v4330_v60  ;;  %v4331_v62 = vunpack.i.l.bf16 %v4330_v60  ;;  %v4468_v56 = vld [vmem:[%s5945_s3 + $0x200] ss:$8 sps:$4 sm:$0xff]  }
 0x1e9   : > { %v1425_v63 = vmax.f32 %v1423_v58, 0.0  ;;  %v1409_v0 = vmax.f32 %v1407_v59, 0.0  ;;  %v4473_v59 = vld [vmem:[%s5945_s3 + $0x214] ss:$8 sps:$4 sm:$0xff]  }
 0x1ea   : > { %v1402_v1 = vsel %vm1401_vm1, %v4331_v62, %v4326_v55  ;;  %v1418_v2 = vsel %vm1401_vm1, %v4332_v61, %v4327_v54  ;;  %v4471_v61 = vld [vmem:[%s5945_s3 + $0x210] ss:$8 sps:$4 sm:$0xff]   ;;  %v4476_v62 = vld [vmem:[%s5945_s3 + $0x224] ss:$8 sps:$4 sm:$0xff]  }
 0x1eb   : > { %v5225_v3 = vpack.c.bf16 %v1425_v63, %v1425_v63  ;;  %v5227_v4 = vpack.c.bf16 %v1409_v0, %v1409_v0  ;;  %v1406_v5 = vmax.f32 %v1389_v51, %v1402_v1  ;;  %v1422_v6 = vmax.f32 %v1393_v49, %v1418_v2  ;;  %v4465_v51 = vld [vmem:[%s5945_s3 + $0x1f0] ss:$8 sps:$4 sm:$0xff]   ;;  %v4474_v63 = vld [vmem:[%s5945_s3 + $0x220] ss:$8 sps:$4 sm:$0xff]   ;;  %v4479_v0 = vld [vmem:[%s5945_s3 + $0x234] ss:$8 sps:$4 sm:$0xff]  }
 0x1ec   : > { %v4477_v1 = vld [vmem:[%s5945_s3 + $0x230] ss:$8 sps:$4 sm:$0xff]   ;;  %v4482_v2 = vld [vmem:[%s5945_s3 + $0x244] ss:$8 sps:$4 sm:$0xff]  }
 0x1ed   : > { %v1408_v7 = vmax.f32 %v1406_v5, 0.0  ;;  %v1424_v8 = vmax.f32 %v1422_v6, 0.0  ;;  %2458 = vmatprep.mubr.bf16.mxu0 %v5227_v4  ;;  %2669 = vmatprep.mubr.bf16.mxu1 %v5225_v3  ;;  %v1438_v9 = vshll.u32 %v5227_v4, 16  ;;  %v1436_v13 = vshrl.u32 %v5227_v4, 16  ;;  %v4480_v5 = vld [vmem:[%s5945_s3 + $0x240] ss:$8 sps:$4 sm:$0xff]  }
 0x1ee   : > { %v1454_v50 = vshll.u32 %v5225_v3, 16  ;;  %v1452_v58 = vshrl.u32 %v5225_v3, 16  ;;  %v4485_v6 = vld [vmem:[%s5945_s3 + $0x254] ss:$8 sps:$4 sm:$0xff]  }
 0x1ef   : > { %v5235_v11 = vpack.c.bf16 %v1424_v8, %v1424_v8  ;;  %v5237_v12 = vpack.c.bf16 %v1408_v7, %v1408_v7  ;;  %v1440_v14 = vrot.slane %v1438_v9, 1  ;;  %v4483_v7 = vld [vmem:[%s5945_s3 + $0x250] ss:$8 sps:$4 sm:$0xff]   ;;  %v4488_v8 = vld [vmem:[%s5945_s3 + $0x264] ss:$8 sps:$4 sm:$0xff]  }
 0x1f0   : > { %v1456_v55 = vrot.slane %v1454_v50, 1  ;;  %v4486_v9 = vld [vmem:[%s5945_s3 + $0x260] ss:$8 sps:$4 sm:$0xff]   ;;  %v4531_v50 = vld [vmem:[%s5945_s3 + $0x350] ss:$8 sps:$4 sm:$0xff]  }
 0x1f1   : > { %2459 = vmatmul.mubr.bf16.vlgmr.msra.gmra.mrb[8].mxu0 %v5237_v12  ;;  %2670 = vmatmul.mubr.bf16.vlgmr.msra.gmra.mrb[12].mxu1 %v5235_v11  ;;  %v5245_v16 = vor.u32 %v1440_v14, %v1436_v13  ;;  %v1431_v49 = vshll.u32 %v5237_v12, 16  ;;  %v1429_v54 = vshrl.u32 %v5237_v12, 16  ;;  %v4489_v13 = vld [vmem:[%s5945_s3 + $0x270] ss:$8 sps:$4 sm:$0xff]   ;;  %v4494_v14 = vld [vmem:[%s5945_s3 + $0x284] ss:$8 sps:$4 sm:$0xff]  }
 0x1f2   : > { %2468 = vmatpush1.bf16.msra.mxu0 %v4420_v10  ;;  %2679 = vmatpush1.bf16.msra.mxu1 %v4420_v10  ;;  %v5353_v60 = vor.u32 %v1456_v55, %v1452_v58  ;;  %v4491_v10 = vld [vmem:[%s5945_s3 + $0x274] ss:$8 sps:$4 sm:$0xff]   ;;  %v4542_v55 = vld [vmem:[%s5945_s3 + $0x384] ss:$8 sps:$4 sm:$0xff]   ;;  %v4543_v58 = vld [vmem:[%s5945_s3 + $0x390] ss:$8 sps:$4 sm:$0xff]  }
 0x1f3   : > { %2499 = vmatprep.mubr.bf16.mxu0 %v5225_v3  ;;  %2710 = vmatprep.mubr.bf16.mxu1 %v5245_v16  ;;  %v1433_v53 = vrot.slane %v1431_v49, 1  ;;  %v4533_v49 = vld [vmem:[%s5945_s3 + $0x354] ss:$8 sps:$4 sm:$0xff]  }
 0x1f4   : > { %2469 = vmatprep.subr.bf16.mxu0 %v4425_v15  ;;  %2680 = vmatprep.subr.bf16.mxu1 %v4425_v15  ;;  %v4492_v15 = vld [vmem:[%s5945_s3 + $0x280] ss:$8 sps:$4 sm:$0xff]  }
 0x1f5   : > { %v5345_v57 = vor.u32 %v1433_v53, %v1429_v54  ;;  %v4539_v53 = vld [vmem:[%s5945_s3 + $0x374] ss:$8 sps:$4 sm:$0xff]   ;;  %v4537_v54 = vld [vmem:[%s5945_s3 + $0x370] ss:$8 sps:$4 sm:$0xff]  }
 0x1f6   : > { %2470 = vmatpush1.bf16.msra.mxu0 %v4423_v17  ;;  %2681 = vmatpush1.bf16.msra.mxu1 %v4423_v17  ;;  %v4495_v17 = vld [vmem:[%s5945_s3 + $0x290] ss:$8 sps:$4 sm:$0xff]  }
 0x1f7   : > { %2471 = vmatprep.subr.bf16.mxu0 %v4428_v18  ;;  %2682 = vmatprep.subr.bf16.mxu1 %v4428_v18  ;;  %v4500_v18 = vld [vmem:[%s5945_s3 + $0x2a4] ss:$8 sps:$4 sm:$0xff]  }
 0x1fa   : > { %2472 = vmatpush1.bf16.msra.mxu0 %v4426_v19  ;;  %2683 = vmatpush1.bf16.msra.mxu1 %v4426_v19  ;;  %v4498_v19 = vld [vmem:[%s5945_s3 + $0x2a0] ss:$8 sps:$4 sm:$0xff]  }
 0x1fb   : > { %2473 = vmatprep.subr.bf16.mxu0 %v4431_v20  ;;  %2684 = vmatprep.subr.bf16.mxu1 %v4431_v20  ;;  %v4503_v20 = vld [vmem:[%s5945_s3 + $0x2b4] ss:$8 sps:$4 sm:$0xff]  }
 0x1fe   : > { %2474 = vmatpush1.bf16.msra.mxu0 %v4429_v21  ;;  %2685 = vmatpush1.bf16.msra.mxu1 %v4429_v21  ;;  %v4501_v21 = vld [vmem:[%s5945_s3 + $0x2b0] ss:$8 sps:$4 sm:$0xff]  }
 0x1ff   : > { %2475 = vmatprep.subr.bf16.mxu0 %v4434_v22  ;;  %2686 = vmatprep.subr.bf16.mxu1 %v4434_v22  ;;  %v4506_v22 = vld [vmem:[%s5945_s3 + $0x2c4] ss:$8 sps:$4 sm:$0xff]  }
 0x202   : > { %2476 = vmatpush1.bf16.msra.mxu0 %v4432_v23  ;;  %2687 = vmatpush1.bf16.msra.mxu1 %v4432_v23  ;;  %v4504_v23 = vld [vmem:[%s5945_s3 + $0x2c0] ss:$8 sps:$4 sm:$0xff]  }
 0x203   : > { %2477 = vmatprep.subr.bf16.mxu0 %v4437_v24  ;;  %2688 = vmatprep.subr.bf16.mxu1 %v4437_v24  ;;  %v4509_v24 = vld [vmem:[%s5945_s3 + $0x2d4] ss:$8 sps:$4 sm:$0xff]  }
 0x206   : > { %2478 = vmatpush1.bf16.msra.mxu0 %v4435_v25  ;;  %2689 = vmatpush1.bf16.msra.mxu1 %v4435_v25  ;;  %v4507_v25 = vld [vmem:[%s5945_s3 + $0x2d0] ss:$8 sps:$4 sm:$0xff]  }
 0x207   : > { %2479 = vmatprep.subr.bf16.mxu0 %v4440_v26  ;;  %2690 = vmatprep.subr.bf16.mxu1 %v4440_v26  ;;  %v4512_v26 = vld [vmem:[%s5945_s3 + $0x2e4] ss:$8 sps:$4 sm:$0xff]  }
 0x20a   : > { %2480 = vmatpush1.bf16.msra.mxu0 %v4438_v29  ;;  %2691 = vmatpush1.bf16.msra.mxu1 %v4438_v29  ;;  %v4510_v29 = vld [vmem:[%s5945_s3 + $0x2e0] ss:$8 sps:$4 sm:$0xff]  }
 0x20b   : > { %2481 = vmatprep.subr.bf16.mxu0 %v4443_v30  ;;  %2692 = vmatprep.subr.bf16.mxu1 %v4443_v30  ;;  %v4515_v30 = vld [vmem:[%s5945_s3 + $0x2f4] ss:$8 sps:$4 sm:$0xff]  }
 0x20e   : > { %2482 = vmatpush1.bf16.msra.mxu0 %v4441_v32  ;;  %2693 = vmatpush1.bf16.msra.mxu1 %v4441_v32  ;;  %v1447_v32 = vshll.u32 %v5235_v11, 16 }
 0x20f   : > { %2483 = vmatprep.subr.bf16.mxu0 %v4446_v33  ;;  %2694 = vmatprep.subr.bf16.mxu1 %v4446_v33  ;;  %v4513_v33 = vld [vmem:[%s5945_s3 + $0x2f0] ss:$8 sps:$4 sm:$0xff]  }
 0x212   : > { %2484 = vmatpush1.bf16.msra.mxu0 %v4444_v34  ;;  %2695 = vmatpush1.bf16.msra.mxu1 %v4444_v34  ;;  %v4518_v34 = vld [vmem:[%s5945_s3 + $0x304] ss:$8 sps:$4 sm:$0xff]  }
 0x213   : > { %2485 = vmatprep.subr.bf16.mxu0 %v4449_v36  ;;  %2696 = vmatprep.subr.bf16.mxu1 %v4449_v36  ;;  %v1449_v36 = vrot.slane %v1447_v32, 1  ;;  %v4593_v32 = vld [vmem:[%s5945_s3 + $0x494] ss:$8 sps:$4 sm:$0xff]  }
 0x216   : > { %2486 = vmatpush1.bf16.msra.mxu0 %v4447_v37  ;;  %2697 = vmatpush1.bf16.msra.mxu1 %v4447_v37  ;;  %v4516_v37 = vld [vmem:[%s5945_s3 + $0x300] ss:$8 sps:$4 sm:$0xff]  }
 0x217   : > { %2487 = vmatprep.subr.bf16.mxu0 %v4452_v38  ;;  %2698 = vmatprep.subr.bf16.mxu1 %v4452_v38  ;;  %v1445_v38 = vshrl.u32 %v5235_v11, 16 }
 0x21a   : > { %2488 = vmatpush1.bf16.msra.mxu0 %v4450_v39  ;;  %2699 = vmatpush1.bf16.msra.mxu1 %v4450_v39  ;;  %v5452_v39 = vor.u32 %v1449_v36, %v1445_v38  ;;  %v4594_v36 = vld [vmem:[%s5945_s3 + $0x4a0] ss:$8 sps:$4 sm:$0xff]   ;;  %v4597_v38 = vld [vmem:[%s5945_s3 + $0x4b0] ss:$8 sps:$4 sm:$0xff]  }
 0x21b   : > { %2489 = vmatprep.subr.bf16.mxu0 %v4455_v40  ;;  %2700 = vmatprep.subr.bf16.mxu1 %v4455_v40  ;;  %v4521_v40 = vld [vmem:[%s5945_s3 + $0x314] ss:$8 sps:$4 sm:$0xff]  }
 0x21e   : > { %2490 = vmatpush1.bf16.msra.mxu0 %v4453_v41  ;;  %2701 = vmatpush1.bf16.msra.mxu1 %v4453_v41  ;;  %v1463_v41 = vrot.slane %v5227_v4, 1  ;;  %v4575_v4 = vld [vmem:[%s5945_s3 + $0x434] ss:$8 sps:$4 sm:$0xff]  }
 0x21f   : > { %2491 = vmatprep.subr.bf16.mxu0 %v4458_v42  ;;  %2702 = vmatprep.subr.bf16.mxu1 %v4458_v42  ;;  %v4519_v42 = vld [vmem:[%s5945_s3 + $0x310] ss:$8 sps:$4 sm:$0xff]  }
 0x222   : > { %2492 = vmatpush1.bf16.msra.mxu0 %v4456_v43  ;;  %2703 = vmatpush1.bf16.msra.mxu1 %v4456_v43  ;;  %v4524_v43 = vld [vmem:[%s5945_s3 + $0x324] ss:$8 sps:$4 sm:$0xff]  }
 0x223   : > { %2493 = vmatprep.subr.bf16.mxu0 %v4461_v44  ;;  %2704 = vmatprep.subr.bf16.mxu1 %v4461_v44  ;;  %v4522_v44 = vld [vmem:[%s5945_s3 + $0x320] ss:$8 sps:$4 sm:$0xff]  }
 0x226   : > { %2494 = vmatpush1.bf16.msra.mxu0 %v4459_v45  ;;  %2705 = vmatpush1.bf16.msra.mxu1 %v4459_v45  ;;  %v4527_v45 = vld [vmem:[%s5945_s3 + $0x334] ss:$8 sps:$4 sm:$0xff]  }
 0x227   : > { %2495 = vmatprep.subr.bf16.mxu0 %v4464_v46  ;;  %2706 = vmatprep.subr.bf16.mxu1 %v4464_v46  ;;  %v4525_v46 = vld [vmem:[%s5945_s3 + $0x330] ss:$8 sps:$4 sm:$0xff]  }
 0x22a   : > { %2496 = vmatpush1.bf16.msra.mxu0 %v4462_v47  ;;  %2707 = vmatpush1.bf16.msra.mxu1 %v4462_v47  ;;  %v4530_v47 = vld [vmem:[%s5945_s3 + $0x344] ss:$8 sps:$4 sm:$0xff]  }
 0x22b   : > { %2497 = vmatprep.subr.bf16.mxu0 %v4467_v48  ;;  %2708 = vmatprep.subr.bf16.mxu1 %v4467_v48  ;;  %v4528_v48 = vld [vmem:[%s5945_s3 + $0x340] ss:$8 sps:$4 sm:$0xff]  }
 0x22e   : > { %2498 = vmatpush1.bf16.msra.mxu0 %v4465_v51  ;;  %2709 = vmatpush1.bf16.msra.mxu1 %v4465_v51  ;;  %v4536_v51 = vld [vmem:[%s5945_s3 + $0x364] ss:$8 sps:$4 sm:$0xff]  }
 0x22f   : > { %2508 = vmatprep.subr.bf16.mxu0 %v4470_v52  ;;  %2719 = vmatprep.subr.bf16.mxu1 %v4470_v52  ;;  %v4534_v52 = vld [vmem:[%s5945_s3 + $0x360] ss:$8 sps:$4 sm:$0xff]  }
 0x231   : > { %2500 = vmatmul.mubr.bf16.vlgmr.msra.gmra.mrb[8].mxu0 %v5235_v11  ;;  %2711 = vmatmul.mubr.bf16.vlgmr.msra.gmra.mrb[12].mxu1 %v5345_v57 }
 0x232   : > { %2509 = vmatpush1.bf16.msra.mxu0 %v4468_v56  ;;  %2540 = vmatprep.mubr.bf16.mxu0 %v5245_v16  ;;  %v4497_v16 = vld [vmem:[%s5945_s3 + $0x294] ss:$8 sps:$4 sm:$0xff]  }
 0x233   : > { %2720 = vmatpush1.bf16.msra.mxu1 %v4468_v56  ;;  %2751 = vmatprep.mubr.bf16.mxu1 %v5353_v60  ;;  %v4540_v56 = vld [vmem:[%s5945_s3 + $0x380] ss:$8 sps:$4 sm:$0xff]  }
 0x234   : > { %2510 = vmatprep.subr.bf16.mxu0 %v4473_v59  ;;  %2721 = vmatprep.subr.bf16.mxu1 %v4473_v59  ;;  %v4548_v59 = vld [vmem:[%s5945_s3 + $0x3a4] ss:$8 sps:$4 sm:$0xff]  }
 0x236   : > { %2511 = vmatpush1.bf16.msra.mxu0 %v4471_v61 }
 0x237   : > { %2722 = vmatpush1.bf16.msra.mxu1 %v4471_v61  ;;  %2512 = vmatprep.subr.bf16.mxu0 %v4476_v62  ;;  %v4551_v61 = vld [vmem:[%s5945_s3 + $0x3b4] ss:$8 sps:$4 sm:$0xff]  }
 0x238   : > { %2723 = vmatprep.subr.bf16.mxu1 %v4476_v62  ;;  %v4549_v62 = vld [vmem:[%s5945_s3 + $0x3b0] ss:$8 sps:$4 sm:$0xff]  }
 0x23a   : > { %2513 = vmatpush1.bf16.msra.mxu0 %v4474_v63 }
 0x23b   : > { %2724 = vmatpush1.bf16.msra.mxu1 %v4474_v63  ;;  %2514 = vmatprep.subr.bf16.mxu0 %v4479_v0  ;;  %v4554_v63 = vld [vmem:[%s5945_s3 + $0x3c4] ss:$8 sps:$4 sm:$0xff]  }
 0x23c   : > { %2725 = vmatprep.subr.bf16.mxu1 %v4479_v0  ;;  %v4552_v0 = vld [vmem:[%s5945_s3 + $0x3c0] ss:$8 sps:$4 sm:$0xff]  }
 0x23e   : > { %2515 = vmatpush1.bf16.msra.mxu0 %v4477_v1 }
 0x23f   : > { %2726 = vmatpush1.bf16.msra.mxu1 %v4477_v1  ;;  %2516 = vmatprep.subr.bf16.mxu0 %v4482_v2  ;;  %v4557_v1 = vld [vmem:[%s5945_s3 + $0x3d4] ss:$8 sps:$4 sm:$0xff]  }
 0x240   : > { %2727 = vmatprep.subr.bf16.mxu1 %v4482_v2  ;;  %v4555_v2 = vld [vmem:[%s5945_s3 + $0x3d0] ss:$8 sps:$4 sm:$0xff]  }
 0x242   : > { %2517 = vmatpush1.bf16.msra.mxu0 %v4480_v5 }
 0x243   : > { %2728 = vmatpush1.bf16.msra.mxu1 %v4480_v5  ;;  %2518 = vmatprep.subr.bf16.mxu0 %v4485_v6  ;;  %v4560_v5 = vld [vmem:[%s5945_s3 + $0x3e4] ss:$8 sps:$4 sm:$0xff]  }
 0x244   : > { %2729 = vmatprep.subr.bf16.mxu1 %v4485_v6  ;;  %v4558_v6 = vld [vmem:[%s5945_s3 + $0x3e0] ss:$8 sps:$4 sm:$0xff]  }
 0x246   : > { %2519 = vmatpush1.bf16.msra.mxu0 %v4483_v7 }
 0x247   : > { %2730 = vmatpush1.bf16.msra.mxu1 %v4483_v7  ;;  %2520 = vmatprep.subr.bf16.mxu0 %v4488_v8  ;;  %v4563_v7 = vld [vmem:[%s5945_s3 + $0x3f4] ss:$8 sps:$4 sm:$0xff]  }
 0x248   : > { %2731 = vmatprep.subr.bf16.mxu1 %v4488_v8  ;;  %v4561_v8 = vld [vmem:[%s5945_s3 + $0x3f0] ss:$8 sps:$4 sm:$0xff]  }
 0x24a   : > { %2521 = vmatpush1.bf16.msra.mxu0 %v4486_v9 }
 0x24b   : > { %2732 = vmatpush1.bf16.msra.mxu1 %v4486_v9  ;;  %2522 = vmatprep.subr.bf16.mxu0 %v4491_v10  ;;  %v4566_v9 = vld [vmem:[%s5945_s3 + $0x404] ss:$8 sps:$4 sm:$0xff]  }
 0x24c   : > { %2733 = vmatprep.subr.bf16.mxu1 %v4491_v10  ;;  %v4564_v10 = vld [vmem:[%s5945_s3 + $0x400] ss:$8 sps:$4 sm:$0xff]  }
 0x24e   : > { %2523 = vmatpush1.bf16.msra.mxu0 %v4489_v13 }
 0x24f   : > { %2734 = vmatpush1.bf16.msra.mxu1 %v4489_v13  ;;  %2524 = vmatprep.subr.bf16.mxu0 %v4494_v14  ;;  %v1462_v13 = vrot.slane %v5237_v12, 1  ;;  %v4616_v12 = vld [vmem:[%s5947_s5 + $0x48] sm:$0xff]  }
 0x250   : > { %2735 = vmatprep.subr.bf16.mxu1 %v4494_v14  ;;  %v4569_v14 = vld [vmem:[%s5945_s3 + $0x414] ss:$8 sps:$4 sm:$0xff]  }
 0x252   : > { %2525 = vmatpush1.bf16.msra.mxu0 %v4492_v15 }
 0x253   : > { %2736 = vmatpush1.bf16.msra.mxu1 %v4492_v15  ;;  %2526 = vmatprep.subr.bf16.mxu0 %v4497_v16  ;;  %v2634_v15 = vrot.slane %v5225_v3, 1  ;;  %v4570_v3 = vld [vmem:[%s5945_s3 + $0x420] ss:$8 sps:$4 sm:$0xff]  }
 0x254   : > { %2737 = vmatprep.subr.bf16.mxu1 %v4497_v16  ;;  %v4567_v16 = vld [vmem:[%s5945_s3 + $0x410] ss:$8 sps:$4 sm:$0xff]  }
 0x256   : > { %2527 = vmatpush1.bf16.msra.mxu0 %v4495_v17 }
 0x257   : > { %2738 = vmatpush1.bf16.msra.mxu1 %v4495_v17  ;;  %2528 = vmatprep.subr.bf16.mxu0 %v4500_v18  ;;  %v4572_v17 = vld [vmem:[%s5945_s3 + $0x424] ss:$8 sps:$4 sm:$0xff]  }
 0x258   : > { %2739 = vmatprep.subr.bf16.mxu1 %v4500_v18  ;;  %v4573_v18 = vld [vmem:[%s5945_s3 + $0x430] ss:$8 sps:$4 sm:$0xff]  }
 0x25a   : > { %2529 = vmatpush1.bf16.msra.mxu0 %v4498_v19 }
 0x25b   : > { %2740 = vmatpush1.bf16.msra.mxu1 %v4498_v19  ;;  %2530 = vmatprep.subr.bf16.mxu0 %v4503_v20  ;;  %v4578_v19 = vld [vmem:[%s5945_s3 + $0x444] ss:$8 sps:$4 sm:$0xff]  }
 0x25c   : > { %2741 = vmatprep.subr.bf16.mxu1 %v4503_v20  ;;  %v4576_v20 = vld [vmem:[%s5945_s3 + $0x440] ss:$8 sps:$4 sm:$0xff]  }
 0x25e   : > { %2531 = vmatpush1.bf16.msra.mxu0 %v4501_v21 }
 0x25f   : > { %2742 = vmatpush1.bf16.msra.mxu1 %v4501_v21  ;;  %2532 = vmatprep.subr.bf16.mxu0 %v4506_v22  ;;  %v4581_v21 = vld [vmem:[%s5945_s3 + $0x454] ss:$8 sps:$4 sm:$0xff]  }
 0x260   : > { %2743 = vmatprep.subr.bf16.mxu1 %v4506_v22  ;;  %v4579_v22 = vld [vmem:[%s5945_s3 + $0x450] ss:$8 sps:$4 sm:$0xff]  }
 0x262   : > { %2533 = vmatpush1.bf16.msra.mxu0 %v4504_v23 }
 0x263   : > { %2744 = vmatpush1.bf16.msra.mxu1 %v4504_v23  ;;  %2534 = vmatprep.subr.bf16.mxu0 %v4509_v24  ;;  %v4584_v23 = vld [vmem:[%s5945_s3 + $0x464] ss:$8 sps:$4 sm:$0xff]  }
 0x264   : > { %2745 = vmatprep.subr.bf16.mxu1 %v4509_v24  ;;  %v4582_v24 = vld [vmem:[%s5945_s3 + $0x460] ss:$8 sps:$4 sm:$0xff]  }
 0x266   : > { %2535 = vmatpush1.bf16.msra.mxu0 %v4507_v25 }
 0x267   : > { %2746 = vmatpush1.bf16.msra.mxu1 %v4507_v25  ;;  %2536 = vmatprep.subr.bf16.mxu0 %v4512_v26  ;;  %v4587_v25 = vld [vmem:[%s5945_s3 + $0x474] ss:$8 sps:$4 sm:$0xff]  }
 0x268   : > { %2747 = vmatprep.subr.bf16.mxu1 %v4512_v26  ;;  %v4585_v26 = vld [vmem:[%s5945_s3 + $0x470] ss:$8 sps:$4 sm:$0xff]  }
 0x26a   : > { %2537 = vmatpush1.bf16.msra.mxu0 %v4510_v29 }
 0x26b   : > { %2748 = vmatpush1.bf16.msra.mxu1 %v4510_v29  ;;  %2538 = vmatprep.subr.bf16.mxu0 %v4515_v30  ;;  %v4590_v29 = vld [vmem:[%s5945_s3 + $0x484] ss:$8 sps:$4 sm:$0xff]  }
 0x26c   : > { %2749 = vmatprep.subr.bf16.mxu1 %v4515_v30  ;;  %v4588_v30 = vld [vmem:[%s5945_s3 + $0x480] ss:$8 sps:$4 sm:$0xff]  }
 0x26e   : > { %2539 = vmatpush1.bf16.msra.mxu0 %v4513_v33 }
 0x26f   : > { %2750 = vmatpush1.bf16.msra.mxu1 %v4513_v33  ;;  %2549 = vmatprep.subr.bf16.mxu0 %v4518_v34  ;;  %v4591_v33 = vld [vmem:[%s5945_s3 + $0x490] ss:$8 sps:$4 sm:$0xff]  }
 0x270   : > { %2760 = vmatprep.subr.bf16.mxu1 %v4518_v34  ;;  %v4596_v34 = vld [vmem:[%s5945_s3 + $0x4a4] ss:$8 sps:$4 sm:$0xff]  }
 0x271   : > { %2541 = vmatmul.mubr.bf16.vlgmr.msra.gmra.mrb[8].mxu0 %v5345_v57  ;;  %v4545_v57 = vld [vmem:[%s5945_s3 + $0x394] ss:$8 sps:$4 sm:$0xff]  }
 0x272   : > { %2752 = vmatmul.mubr.bf16.vlgmr.msra.gmra.mrb[12].mxu1 %v5452_v39  ;;  %2550 = vmatpush1.bf16.msra.mxu0 %v4516_v37 }
 0x273   : > { %2581 = vmatprep.mubr.bf16.mxu0 %v5353_v60  ;;  %2761 = vmatpush1.bf16.msra.mxu1 %v4516_v37  ;;  %v4546_v60 = vld [vmem:[%s5945_s3 + $0x3a0] ss:$8 sps:$4 sm:$0xff]   ;;  %v4599_v37 = vld [vmem:[%s5945_s3 + $0x4b4] ss:$8 sps:$4 sm:$0xff]  }
 0x274   : > { %2792 = vmatprep.mubr.bf16.mxu1 %v1463_v41  ;;  %2551 = vmatprep.subr.bf16.mxu0 %v4521_v40 }
 0x275   : > { %2762 = vmatprep.subr.bf16.mxu1 %v4521_v40  ;;  %v4600_v40 = vld [vmem:[%s5945_s3 + $0x4c0] ss:$8 sps:$4 sm:$0xff]  }
 0x276   : > { %2552 = vmatpush1.bf16.msra.mxu0 %v4519_v42 }
 0x277   : > { %2763 = vmatpush1.bf16.msra.mxu1 %v4519_v42  ;;  %2553 = vmatprep.subr.bf16.mxu0 %v4524_v43  ;;  %v4603_v42 = vld [vmem:[%s5945_s3 + $0x4d0] ss:$8 sps:$4 sm:$0xff]  }
 0x278   : > { %2764 = vmatprep.subr.bf16.mxu1 %v4524_v43  ;;  %v4608_v43 = vld [vmem:[%s5945_s3 + $0x4e4] ss:$8 sps:$4 sm:$0xff]  }
 0x27a   : > { %2554 = vmatpush1.bf16.msra.mxu0 %v4522_v44 }
 0x27b   : > { %2765 = vmatpush1.bf16.msra.mxu1 %v4522_v44  ;;  %2555 = vmatprep.subr.bf16.mxu0 %v4527_v45  ;;  %v4606_v44 = vld [vmem:[%s5945_s3 + $0x4e0] ss:$8 sps:$4 sm:$0xff]  }
 0x27c   : > { %2766 = vmatprep.subr.bf16.mxu1 %v4527_v45  ;;  %v4611_v45 = vld [vmem:[%s5945_s3 + $0x4f4] ss:$8 sps:$4 sm:$0xff]  }
 0x27e   : > { %2556 = vmatpush1.bf16.msra.mxu0 %v4525_v46 }
 0x27f   : > { %2767 = vmatpush1.bf16.msra.mxu1 %v4525_v46  ;;  %2557 = vmatprep.subr.bf16.mxu0 %v4530_v47  ;;  %v4609_v46 = vld [vmem:[%s5945_s3 + $0x4f0] ss:$8 sps:$4 sm:$0xff]  }
 0x280   : > { %2768 = vmatprep.subr.bf16.mxu1 %v4530_v47  ;;  %v2633_v47 = vrot.slane %v5235_v11, 1  ;;  %v4615_v11 = vld [vmem:[%s5947_s5 + $0x80] sm:$0xff]  }
 0x282   : > { %2558 = vmatpush1.bf16.msra.mxu0 %v4528_v48 }
 0x283   : > { %2769 = vmatpush1.bf16.msra.mxu1 %v4528_v48  ;;  %2559 = vmatprep.subr.bf16.mxu0 %v4533_v49  ;;  %v4612_v48 = vld [vmem:[%s5947_s5 + $0x40] sm:$0xff]  }
 0x284   : > { %2770 = vmatprep.subr.bf16.mxu1 %v4533_v49  ;;  %v4613_v49 = vld [vmem:[%s5947_s5] sm:$0xff]  }
 0x286   : > { %2560 = vmatpush1.bf16.msra.mxu0 %v4531_v50 }
 0x287   : > { %2771 = vmatpush1.bf16.msra.mxu1 %v4531_v50  ;;  %2561 = vmatprep.subr.bf16.mxu0 %v4536_v51  ;;  %v4614_v50 = vld [vmem:[%s5947_s5 + $0xc0] sm:$0xff]  }
 0x288   : > { %2772 = vmatprep.subr.bf16.mxu1 %v4536_v51  ;;  %v4618_v51 = vld [vmem:[%s5947_s5 + $0xc8] sm:$0xff]  }
 0x28a   : > { %2562 = vmatpush1.bf16.msra.mxu0 %v4534_v52 }
 0x28b   : > { %2773 = vmatpush1.bf16.msra.mxu1 %v4534_v52  ;;  %2563 = vmatprep.subr.bf16.mxu0 %v4539_v53  ;;  %v4617_v52 = vld [vmem:[%s5947_s5 + $0x8] sm:$0xff]  }
 0x28c   : > { %2774 = vmatprep.subr.bf16.mxu1 %v4539_v53  ;;  %v4619_v53 = vld [vmem:[%s5947_s5 + $0x88] sm:$0xff]  }
 0x28e   : > { %2564 = vmatpush1.bf16.msra.mxu0 %v4537_v54 }
 0x28f   : > { %2775 = vmatpush1.bf16.msra.mxu1 %v4537_v54  ;;  %2565 = vmatprep.subr.bf16.mxu0 %v4542_v55  ;;  %v4620_v54 = vld [vmem:[%s5947_s5 + $0x50] sm:$0xff]  }
 0x290   : > { %2776 = vmatprep.subr.bf16.mxu1 %v4542_v55  ;;  %v4622_v55 = vld [vmem:[%s5947_s5 + $0xd0] sm:$0xff]  }
 0x292   : > { %2566 = vmatpush1.bf16.msra.mxu0 %v4540_v56 }
 0x293   : > { %2777 = vmatpush1.bf16.msra.mxu1 %v4540_v56  ;;  %2567 = vmatprep.subr.bf16.mxu0 %v4545_v57  ;;  %v4621_v56 = vld [vmem:[%s5947_s5 + $0x10] sm:$0xff]  }
 0x294   : > { %2778 = vmatprep.subr.bf16.mxu1 %v4545_v57  ;;  %v4623_v57 = vld [vmem:[%s5947_s5 + $0x90] sm:$0xff]  }
 0x296   : > { %2568 = vmatpush1.bf16.msra.mxu0 %v4543_v58 }
 0x297   : > { %2779 = vmatpush1.bf16.msra.mxu1 %v4543_v58  ;;  %2569 = vmatprep.subr.bf16.mxu0 %v4548_v59  ;;  %v4624_v58 = vld [vmem:[%s5947_s5 + $0x58] sm:$0xff]  }
 0x298   : > { %2780 = vmatprep.subr.bf16.mxu1 %v4548_v59  ;;  %v4626_v59 = vld [vmem:[%s5947_s5 + $0xd8] sm:$0xff]  }
 0x29a   : > { %2570 = vmatpush1.bf16.msra.mxu0 %v4546_v60 }
 0x29b   : > { %2781 = vmatpush1.bf16.msra.mxu1 %v4546_v60  ;;  %2571 = vmatprep.subr.bf16.mxu0 %v4551_v61  ;;  %v4625_v60 = vld [vmem:[%s5947_s5 + $0x18] sm:$0xff]  }
 0x29c   : > { %2782 = vmatprep.subr.bf16.mxu1 %v4551_v61  ;;  %v4627_v61 = vld [vmem:[%s5947_s5 + $0x98] sm:$0xff]  }
 0x29e   : > { %2572 = vmatpush1.bf16.msra.mxu0 %v4549_v62 }
 0x29f   : > { %2783 = vmatpush1.bf16.msra.mxu1 %v4549_v62  ;;  %2573 = vmatprep.subr.bf16.mxu0 %v4554_v63  ;;  %v4628_v62 = vld [vmem:[%s5947_s5 + $0x60] sm:$0xff]  }
 0x2a0   : > { %2784 = vmatprep.subr.bf16.mxu1 %v4554_v63  ;;  %v4630_v63 = vld [vmem:[%s5947_s5 + $0xe0] sm:$0xff]  }
 0x2a2   : > { %2574 = vmatpush1.bf16.msra.mxu0 %v4552_v0 }
 0x2a3   : > { %2785 = vmatpush1.bf16.msra.mxu1 %v4552_v0  ;;  %2575 = vmatprep.subr.bf16.mxu0 %v4557_v1  ;;  %v4629_v0 = vld [vmem:[%s5947_s5 + $0x20] sm:$0xff]  }
 0x2a4   : > { %2786 = vmatprep.subr.bf16.mxu1 %v4557_v1  ;;  %v4631_v1 = vld [vmem:[%s5947_s5 + $0xa0] sm:$0xff]  }
 0x2a6   : > { %2576 = vmatpush1.bf16.msra.mxu0 %v4555_v2 }
 0x2a7   : > { %2787 = vmatpush1.bf16.msra.mxu1 %v4555_v2  ;;  %2577 = vmatprep.subr.bf16.mxu0 %v4560_v5  ;;  %v4632_v2 = vld [vmem:[%s5947_s5 + $0x68] sm:$0xff]  }
 0x2a8   : > { %2788 = vmatprep.subr.bf16.mxu1 %v4560_v5  ;;  %v4634_v5 = vld [vmem:[%s5947_s5 + $0xe8] sm:$0xff]  }
 0x2aa   : > { %2578 = vmatpush1.bf16.msra.mxu0 %v4558_v6 }
 0x2ab   : > { %2789 = vmatpush1.bf16.msra.mxu1 %v4558_v6  ;;  %2579 = vmatprep.subr.bf16.mxu0 %v4563_v7  ;;  %v4633_v6 = vld [vmem:[%s5947_s5 + $0x28] sm:$0xff]  }
 0x2ac   : > { %2790 = vmatprep.subr.bf16.mxu1 %v4563_v7  ;;  %v4635_v7 = vld [vmem:[%s5947_s5 + $0xa8] sm:$0xff]  }
 0x2ae   : > { %2580 = vmatpush1.bf16.msra.mxu0 %v4561_v8 }
 0x2af   : > { %2791 = vmatpush1.bf16.msra.mxu1 %v4561_v8  ;;  %2590 = vmatprep.subr.bf16.mxu0 %v4566_v9  ;;  %v4636_v8 = vld [vmem:[%s5947_s5 + $0x70] sm:$0xff]  }
 0x2b0   : > { %2801 = vmatprep.subr.bf16.mxu1 %v4566_v9  ;;  %v2844_v9 = vld [vmem:[%s5946_s4] sm:$0x3] }
 0x2b1   : > { %2582 = vmatmul.mubr.bf16.vlgmr.msra.gmra.mrb[8].mxu0 %v5452_v39  ;;  %v4602_v39 = vld [vmem:[%s5945_s3 + $0x4c4] ss:$8 sps:$4 sm:$0xff]  }
 0x2b2   : > { %2793 = vmatmul.mubr.bf16.vlgmr.msra.gmra.mrb[12].mxu1 %v1462_v13  ;;  %2591 = vmatpush1.bf16.msra.mxu0 %v4564_v10 }
 0x2b3   : > { %2622 = vmatprep.mubr.bf16.mxu0 %v1463_v41  ;;  %2802 = vmatpush1.bf16.msra.mxu1 %v4564_v10  ;;  %v4605_v41 = vld [vmem:[%s5945_s3 + $0x4d4] ss:$8 sps:$4 sm:$0xff]  }
 0x2b4   : > { %2833 = vmatprep.mubr.bf16.mxu1 %v2634_v15  ;;  %2592 = vmatprep.subr.bf16.mxu0 %v4569_v14  ;;  %v4637_v10 = vld [vmem:[%s5947_s5 + $0x30] sm:$0xff]  }
 0x2b5   : > { %2803 = vmatprep.subr.bf16.mxu1 %v4569_v14  ;;  %v4639_v14 = vld [vmem:[%s5947_s5 + $0xb0] sm:$0xff]  }
 0x2b6   : > { %2593 = vmatpush1.bf16.msra.mxu0 %v4567_v16 }
 0x2b7   : > { %2804 = vmatpush1.bf16.msra.mxu1 %v4567_v16  ;;  %2594 = vmatprep.subr.bf16.mxu0 %v4572_v17  ;;  %v2849_v16 = vrot.slane %v2844_v9, %v1381_v35  ;;  %v4643_v35 = vld [vmem:[%s5947_s5 + $0xb8] sm:$0xff]  }
 0x2b8   : > { %2805 = vmatprep.subr.bf16.mxu1 %v4572_v17  ;;  %v4640_v17 = vld [vmem:[%s5947_s5 + $0x78] sm:$0xff]  }
 0x2ba   : > { %2595 = vmatpush1.bf16.msra.mxu0 %v4570_v3 }
 0x2bb   : > { %2806 = vmatpush1.bf16.msra.mxu1 %v4570_v3  ;;  %2596 = vmatprep.subr.bf16.mxu0 %v4575_v4 }
 0x2bc   : > { %2807 = vmatprep.subr.bf16.mxu1 %v4575_v4 }
 0x2be   : > { %2597 = vmatpush1.bf16.msra.mxu0 %v4573_v18 }
 0x2bf   : > { %2808 = vmatpush1.bf16.msra.mxu1 %v4573_v18  ;;  %2598 = vmatprep.subr.bf16.mxu0 %v4578_v19  ;;  %v2853_v18 = vrot.slane %v2844_v9, %v1385_v31  ;;  %v4670_v9 = vld [vmem:[%s5947_s5 + $0x1f0] sm:$0xff]  }
 0x2c0   : > { %2809 = vmatprep.subr.bf16.mxu1 %v4578_v19  ;;  %v4641_v19 = vld [vmem:[%s5947_s5 + $0x38] sm:$0xff]  }
 0x2c2   : > { %2599 = vmatpush1.bf16.msra.mxu0 %v4576_v20 }
 0x2c3   : > { %2810 = vmatpush1.bf16.msra.mxu1 %v4576_v20  ;;  %2600 = vmatprep.subr.bf16.mxu0 %v4581_v21  ;;  %v4642_v20 = vld [vmem:[%s5947_s5 + $0xf8] sm:$0xff]  }
 0x2c4   : > { %2811 = vmatprep.subr.bf16.mxu1 %v4581_v21 }
 0x2c6   : > { %2601 = vmatpush1.bf16.msra.mxu0 %v4579_v22 }
 0x2c7   : > { %2812 = vmatpush1.bf16.msra.mxu1 %v4579_v22  ;;  %2602 = vmatprep.subr.bf16.mxu0 %v4584_v23 }
 0x2c8   : > { %2813 = vmatprep.subr.bf16.mxu1 %v4584_v23 }
 0x2ca   : > { %2603 = vmatpush1.bf16.msra.mxu0 %v4582_v24 }
 0x2cb   : > { %2814 = vmatpush1.bf16.msra.mxu1 %v4582_v24  ;;  %2604 = vmatprep.subr.bf16.mxu0 %v4587_v25 }
 0x2cc   : > { %2815 = vmatprep.subr.bf16.mxu1 %v4587_v25 }
 0x2ce   : > { %2605 = vmatpush1.bf16.msra.mxu0 %v4585_v26 }
 0x2cf   : > { %2816 = vmatpush1.bf16.msra.mxu1 %v4585_v26  ;;  %2606 = vmatprep.subr.bf16.mxu0 %v4590_v29 }
 0x2d0   : > { %2817 = vmatprep.subr.bf16.mxu1 %v4590_v29  ;;  %v4644_v29 = vld [vmem:[%s5947_s5 + $0x140] sm:$0xff]  }
 0x2d2   : > { %2607 = vmatpush1.bf16.msra.mxu0 %v4588_v30 }
 0x2d3   : > { %2818 = vmatpush1.bf16.msra.mxu1 %v4588_v30  ;;  %2608 = vmatprep.subr.bf16.mxu0 %v4593_v32 }
 0x2d4   : > { %2819 = vmatprep.subr.bf16.mxu1 %v4593_v32  ;;  %v4646_v32 = vld [vmem:[%s5947_s5 + $0x1c0] sm:$0xff]  }
 0x2d6   : > { %2609 = vmatpush1.bf16.msra.mxu0 %v4591_v33 }
 0x2d7   : > { %2820 = vmatpush1.bf16.msra.mxu1 %v4591_v33  ;;  %2610 = vmatprep.subr.bf16.mxu0 %v4596_v34 }
 0x2d8   : > { %2821 = vmatprep.subr.bf16.mxu1 %v4596_v34 }
 0x2da   : > { %2611 = vmatpush1.bf16.msra.mxu0 %v4594_v36 }
 0x2db   : > { %2822 = vmatpush1.bf16.msra.mxu1 %v4594_v36  ;;  %2612 = vmatprep.subr.bf16.mxu0 %v4599_v37 }
 0x2dc   : > { %2823 = vmatprep.subr.bf16.mxu1 %v4599_v37 }
 0x2de   : > { %2613 = vmatpush1.bf16.msra.mxu0 %v4597_v38 }
 0x2df   : > { %2824 = vmatpush1.bf16.msra.mxu1 %v4597_v38  ;;  %2614 = vmatprep.subr.bf16.mxu0 %v4602_v39 }
 0x2e0   : > { %2825 = vmatprep.subr.bf16.mxu1 %v4602_v39 }
 0x2e2   : > { %2615 = vmatpush1.bf16.msra.mxu0 %v4600_v40 }
 0x2e3   : > { %2826 = vmatpush1.bf16.msra.mxu1 %v4600_v40  ;;  %2616 = vmatprep.subr.bf16.mxu0 %v4605_v41 }
 0x2e4   : > { %2827 = vmatprep.subr.bf16.mxu1 %v4605_v41 }
 0x2e6   : > { %2617 = vmatpush1.bf16.msra.mxu0 %v4603_v42 }
 0x2e7   : > { %2828 = vmatpush1.bf16.msra.mxu1 %v4603_v42  ;;  %2618 = vmatprep.subr.bf16.mxu0 %v4608_v43 }
 0x2e8   : > { %2829 = vmatprep.subr.bf16.mxu1 %v4608_v43 }
 0x2ea   : > { %2619 = vmatpush1.bf16.msra.mxu0 %v4606_v44 }
 0x2eb   : > { %2830 = vmatpush1.bf16.msra.mxu1 %v4606_v44  ;;  %2620 = vmatprep.subr.bf16.mxu0 %v4611_v45 }
 0x2ec   : > { %2831 = vmatprep.subr.bf16.mxu1 %v4611_v45 }
 0x2ee   : > { %2621 = vmatpush1.bf16.msra.mxu0 %v4609_v46 }
 0x2ef   : > { %2832 = vmatpush1.bf16.msra.mxu1 %v4609_v46  ;;  %4068 = vmatprep.subr.bf16.mxu0 %v4612_v48  ;;  %v4645_v46 = vld [vmem:[%s5947_s5 + $0x100] sm:$0xff]  }
 0x2f0   : > { %4090 = vmatprep.subr.bf16.mxu1 %v4614_v50  ;;  %v4647_v50 = vld [vmem:[%s5947_s5 + $0x180] sm:$0xff]  }
 0x2f1   : > { %2623 = vmatmul.mubr.bf16.vlgmr.msra.gmra.mrb[8].mxu0 %v1462_v13  ;;  %v4638_v13 = vld [vmem:[%s5947_s5 + $0xf0] sm:$0xff]  }
 0x2f2   : > { %2834 = vmatmul.mubr.bf16.vlgmr.msra.gmra.mrb[12].mxu1 %v2633_v47  ;;  %4069 = vmatpush3.bf16.msra.mxu0 %v4613_v49 }
 0x2f3   : > { %4091 = vmatpush3.bf16.msra.mxu1 %v4615_v11  ;;  %4070 = vmatprep.subr.bf16.mxu0 %v4616_v12  ;;  %v4648_v11 = vld [vmem:[%s5947_s5 + $0x148] sm:$0xff]  }
 0x2f4   : > { %4092 = vmatprep.subr.bf16.mxu1 %v4618_v51  ;;  %v4650_v12 = vld [vmem:[%s5947_s5 + $0x1c8] sm:$0xff]  }
 0x2f6   : > { %4071 = vmatpush3.bf16.msra.mxu0 %v4617_v52  ;;  %v4649_v52 = vld [vmem:[%s5947_s5 + $0x108] sm:$0xff]  }
 0x2f7   : > { %4093 = vmatpush3.bf16.msra.mxu1 %v4619_v53  ;;  %4072 = vmatprep.subr.bf16.mxu0 %v4620_v54  ;;  %v4652_v53 = vld [vmem:[%s5947_s5 + $0x150] sm:$0xff]   ;;  %v4651_v54 = vld [vmem:[%s5947_s5 + $0x188] sm:$0xff]  }
 0x2f8   : > { %4094 = vmatprep.subr.bf16.mxu1 %v4622_v55  ;;  %v4654_v55 = vld [vmem:[%s5947_s5 + $0x1d0] sm:$0xff]  }
 0x2fa   : > { %4073 = vmatpush3.bf16.msra.mxu0 %v4621_v56  ;;  %v4653_v56 = vld [vmem:[%s5947_s5 + $0x110] sm:$0xff]  }
 0x2fb   : > { %4095 = vmatpush3.bf16.msra.mxu1 %v4623_v57  ;;  %4074 = vmatprep.subr.bf16.mxu0 %v4624_v58  ;;  %v4656_v57 = vld [vmem:[%s5947_s5 + $0x158] sm:$0xff]   ;;  %v4655_v58 = vld [vmem:[%s5947_s5 + $0x190] sm:$0xff]  }
 0x2fc   : > { %4096 = vmatprep.subr.bf16.mxu1 %v4626_v59  ;;  %v4658_v59 = vld [vmem:[%s5947_s5 + $0x1d8] sm:$0xff]  }
 0x2fe   : > { %4075 = vmatpush3.bf16.msra.mxu0 %v4625_v60  ;;  %v4657_v60 = vld [vmem:[%s5947_s5 + $0x118] sm:$0xff]  }
 0x2ff   : > { %4097 = vmatpush3.bf16.msra.mxu1 %v4627_v61  ;;  %4076 = vmatprep.subr.bf16.mxu0 %v4628_v62  ;;  %v4660_v61 = vld [vmem:[%s5947_s5 + $0x160] sm:$0xff]   ;;  %v4659_v62 = vld [vmem:[%s5947_s5 + $0x198] sm:$0xff]  }
 0x300   : > { %4098 = vmatprep.subr.bf16.mxu1 %v4630_v63  ;;  %v4662_v63 = vld [vmem:[%s5947_s5 + $0x1e0] sm:$0xff]  }
 0x302   : > { %4077 = vmatpush3.bf16.msra.mxu0 %v4629_v0  ;;  %v4661_v0 = vld [vmem:[%s5947_s5 + $0x120] sm:$0xff]  }
 0x303   : > { %4099 = vmatpush3.bf16.msra.mxu1 %v4631_v1  ;;  %4078 = vmatprep.subr.bf16.mxu0 %v4632_v2  ;;  %v4664_v1 = vld [vmem:[%s5947_s5 + $0x168] sm:$0xff]   ;;  %v4663_v2 = vld [vmem:[%s5947_s5 + $0x1a0] sm:$0xff]  }
 0x304   : > { %4100 = vmatprep.subr.bf16.mxu1 %v4634_v5  ;;  %v4666_v5 = vld [vmem:[%s5947_s5 + $0x1e8] sm:$0xff]  }
 0x306   : > { %4079 = vmatpush3.bf16.msra.mxu0 %v4633_v6  ;;  %v4665_v6 = vld [vmem:[%s5947_s5 + $0x128] sm:$0xff]  }
 0x307   : > { %4101 = vmatpush3.bf16.msra.mxu1 %v4635_v7  ;;  %4080 = vmatprep.subr.bf16.mxu0 %v4636_v8  ;;  %v4668_v7 = vld [vmem:[%s5947_s5 + $0x170] sm:$0xff]   ;;  %v4667_v8 = vld [vmem:[%s5947_s5 + $0x1a8] sm:$0xff]  }
 0x308   : > { %4102 = vmatprep.subr.bf16.mxu1 %v4638_v13  ;;  %v4672_v13 = vld [vmem:[%s5947_s5 + $0x178] sm:$0xff]  }
 0x30a   : > { %4081 = vmatpush3.bf16.msra.mxu0 %v4637_v10  ;;  %v4669_v10 = vld [vmem:[%s5947_s5 + $0x130] sm:$0xff]  }
 0x30b   : > { %4103 = vmatpush3.bf16.msra.mxu1 %v4639_v14  ;;  %4082 = vmatprep.subr.bf16.mxu0 %v4640_v17  ;;  %v4671_v14 = vld [vmem:[%s5947_s5 + $0x1b0] sm:$0xff]   ;;  %v4675_v17 = vld [vmem:[%s5947_s5 + $0x1b8] sm:$0xff]  }
 0x30c   : > { %4104 = vmatprep.subr.bf16.mxu1 %v4642_v20  ;;  %v4677_v20 = vld [vmem:[%s5949_s7 + $0x8] sm:$0xff]  }
 0x30e   : > { %4083 = vmatpush3.bf16.msra.mxu0 %v4641_v19  ;;  %v4755_v19 = vmov 0.0  }
 0x30f   : > { %4105 = vmatpush3.bf16.msra.mxu1 %v4643_v35  ;;  %4112 = vmatprep.subr.bf16.mxu0 %v4644_v29  ;;  %v4678_v35 = vld [vmem:[%s5949_s7 + $0x10] sm:$0xff]  }
 0x310   : > { %4134 = vmatprep.subr.bf16.mxu1 %v4646_v32 }
 0x3c4   : > { %v2624_v15 = vpop.f32.mrb[8].mxu0 }
 0x3c5   : > { %v2835_v3 = vpop.f32.mrb[12].mxu1  ;;  %v2626_v4 = vpop.f32.mrb[9].mxu0 }
 0x3c6   : > { %v2842_v21 = vmax.f32 %v2624_v15, %v2835_v3  ;;  %v2837_v22 = vpop.f32.mrb[13].mxu1  ;;  %v2628_v23 = vpop.f32.mrb[10].mxu0  ;;  %v4674_v15 = vld [vmem:[%s5947_s5 + $0x1f8] sm:$0xff]  }
 0x3c7   : > { %v2843_v24 = vmax.f32 %v2626_v4, %v2837_v22  ;;  %v2839_v28 = vpop.f32.mrb[14].mxu1  ;;  %v2629_v31 = vpop.f32.mrb[11].mxu0  ;;  %v4680_v22 = vld [vmem:[%s5949_s7 + $0x20] sm:$0xff]   ;;  %v4681_v23 = vld [vmem:[%s5949_s7 + $0x28] sm:$0xff]  }
 0x3c8   : > { %v2856_v25 = vadd.f32 %v2849_v16, %v2842_v21  ;;  %v2840_v26 = vpop.f32.mrb[15].mxu1  ;;  %v4673_v16 = vld [vmem:[%s5947_s5 + $0x138] sm:$0xff]  }
 0x3c9   : > { %v2857_v30 = vadd.f32 %v2853_v18, %v2843_v24  ;;  %v4676_v18 = vld [vmem:[%s5949_s7] sm:$0xff]   ;;  %v4679_v21 = vld [vmem:[%s5949_s7 + $0x18] sm:$0xff]   ;;  %v4682_v24 = vld [vmem:[%s5949_s7 + $0x30] sm:$0xff]  }
 0x3ca   : > { %v4683_v28 = vld [vmem:[%s5949_s7 + $0x38] sm:$0xff]  }
 0x3cb   : > { %v4333_v33 = vpack.i.bf16 %v2856_v25, %v2857_v30 }
 0x3cd   : > { %4334 = vrot.lane.b32.xlu1 %v4333_v33, %s4754_s28  ;;  %s3705_s28 = sshll.u32 %s324_s27, 4  ;;  %s5902_s28 = int_to_ptr.vmem [resolvable:$true] %s3705_s28 }
 0x3ce   : > { %s4688_s14 = scalar_lea.vmem %s5902_s28, 16  ;;  %p4695_p0 = scmp.lt.s32.totalorder %s5902_s28, %s4693_s22 }
 0x3cf   : > { %p4689_p11 = scmp.ne.s32.totalorder %s5902_s28, %s4688_s14  ;;  %p4696_p1 = scmp.lt.s32.totalorder %s4694_s23, %s4688_s14 }
 0x3d1   : > { %p4690_p12 = pnand %p4689_p11, %p4846_p5  ;;  %p4697_p2 = por %p4696_p1, %p4695_p0 }
 0x3d3   : > { %p4691_p13 = pneg %p4690_p12 }
 0x3d5   : > { %p4698_p3 = pnand %p4697_p2, %p4691_p13 }
 0x43f   : > { %v4335_v34 = vpop.permute.xlu1 %4334 }
 0x440   : > { %v4337_v36 = vunpack.i.h.bf16 %v4335_v34  ;;  %v4336_v37 = vunpack.i.l.bf16 %v4335_v34 }
 0x442   : > { %v2865_v38 = vsel %vm2864_vm2, %v4337_v36, %v4336_v37  ;;  %v2868_v39 = vsel %vm2864_vm2, %v4336_v37, 0.0 }
 0x443   : > { %v2869_v40 = vmax.f32 %v2856_v25, %v2865_v38  ;;  %v2870_v41 = vmax.f32 %v2857_v30, %v2868_v39  ;;  %v3021_v25 = vld [vmem:[%s5948_s6] sm:$0x1] }
 0x445   : > { %v2871_v42 = vmax.f32 %v2869_v40, 0.0  ;;  %v2872_v43 = vmax.f32 %v2870_v41, 0.0 }
 0x447   : > { %v2874_v44 = vpack.c.bf16 %v2872_v43, %v2872_v43  ;;  %v5765_v45 = vpack.c.bf16 %v2871_v42, %v2871_v42 }
 0x449   : > { %3438 = vmatprep.mubr.bf16.mxu0 %v2874_v44  ;;  %v2879_v47 = vshrl.u32 %v2874_v44, 16  ;;  %v2886_v48 = vrot.slane %v2874_v44, 1  ;;  %v2876_v49 = vshrl.u32 %v5765_v45, 16  ;;  %v2885_v3 = vrot.slane %v5765_v45, 1 }
 0x44a   : > { %3439 = vmatmul.mubr.bf16.vlgmr.msra.gmra.mrb[12].mxu0 %v5765_v45 }
 0x44b   : > { %4113 = vmatpush3.bf16.msra.mxu0 %v4645_v46  ;;  %3478 = vmatprep.mubr.bf16.mxu1 %v2879_v47  ;;  %v2890_v51 = vrot.slane %v2879_v47, 1  ;;  %v2889_v4 = vrot.slane %v2876_v49, 1 }
 0x44c   : > { %3518 = vmatprep.mubr.bf16.mxu0 %v2886_v48  ;;  %3479 = vmatmul.mubr.bf16.vlgmr.msra.gmra.mrb[16].mxu1 %v2876_v49 }
 0x44d   : > { %4135 = vmatpush3.bf16.msra.mxu1 %v4647_v50  ;;  %4114 = vmatprep.subr.bf16.mxu0 %v4648_v11 }
 0x44e   : > { %3558 = vmatprep.mubr.bf16.mxu1 %v2890_v51  ;;  %4136 = vmatprep.subr.bf16.mxu1 %v4650_v12 }
 0x44f   : > { %4115 = vmatpush3.bf16.msra.mxu0 %v4649_v52 }
 0x450   : > { %4116 = vmatprep.subr.bf16.mxu0 %v4652_v53  ;;  %v3674_v53 = vand.u32 127, %v1379_v27 }
 0x451   : > { %4137 = vmatpush3.bf16.msra.mxu1 %v4651_v54  ;;  %v3584_v54 = vld [vmem:[%s5950_s8] sm:$0x1] }
 0x452   : > { %4138 = vmatprep.subr.bf16.mxu1 %v4654_v55  ;;  %vm3675_vm4 = vcmp.lt.s32.totalorder %v3674_v53, 10 }
 0x453   : > { %4117 = vmatpush3.bf16.msra.mxu0 %v4653_v56 }
 0x454   : > { %4118 = vmatprep.subr.bf16.mxu0 %v4656_v57 }
 0x455   : > { %4139 = vmatpush3.bf16.msra.mxu1 %v4655_v58 }
 0x456   : > { %4140 = vmatprep.subr.bf16.mxu1 %v4658_v59 }
 0x457   : > { %4119 = vmatpush3.bf16.msra.mxu0 %v4657_v60 }
 0x458   : > { %4120 = vmatprep.subr.bf16.mxu0 %v4660_v61 }
 0x459   : > { %4141 = vmatpush3.bf16.msra.mxu1 %v4659_v62 }
 0x45a   : > { %4142 = vmatprep.subr.bf16.mxu1 %v4662_v63 }
 0x45b   : > { %4121 = vmatpush3.bf16.msra.mxu0 %v4661_v0 }
 0x45c   : > { %4122 = vmatprep.subr.bf16.mxu0 %v4664_v1 }
 0x45d   : > { %4143 = vmatpush3.bf16.msra.mxu1 %v4663_v2 }
 0x45e   : > { %4144 = vmatprep.subr.bf16.mxu1 %v4666_v5 }
 0x45f   : > { %4123 = vmatpush3.bf16.msra.mxu0 %v4665_v6 }
 0x460   : > { %4124 = vmatprep.subr.bf16.mxu0 %v4668_v7 }
 0x461   : > { %4145 = vmatpush3.bf16.msra.mxu1 %v4667_v8 }
 0x462   : > { %4146 = vmatprep.subr.bf16.mxu1 %v4670_v9 }
 0x463   : > { %4125 = vmatpush3.bf16.msra.mxu0 %v4669_v10 }
 0x464   : > { %4126 = vmatprep.subr.bf16.mxu0 %v4672_v13 }
 0x465   : > { %4147 = vmatpush3.bf16.msra.mxu1 %v4671_v14 }
 0x466   : > { %4148 = vmatprep.subr.bf16.mxu1 %v4674_v15 }
 0x467   : > { %4127 = vmatpush3.bf16.msra.mxu0 %v4673_v16 }
 0x468   : > { %4165 = vmatprep.subr.bf16.mxu0 %v4755_v19 }
 0x469   : > { %4149 = vmatpush3.bf16.msra.mxu1 %v4675_v17 }
 0x46a   : > { %3519 = vmatmul.mubr.bf16.vlgmr.msra.gmra.mrb[16].mxu0 %v2885_v3 }
 0x46b   : > { %4166 = vmatpush3.bf16.msra.mxu0 %v4676_v18  ;;  %4181 = vmatprep.mubr.msk.bf16.mxu0 %vm4756_vm3, %v4755_v19 }
 0x46c   : > { %3559 = vmatmul.mubr.bf16.vlgmr.msra.gmra.mrb[20].mxu1 %v2889_v4  ;;  %4167 = vmatprep.subr.bf16.mxu0 %v4755_v19 }
 0x46f   : > { %4168 = vmatpush3.bf16.msra.mxu0 %v4677_v20 }
 0x470   : > { %4169 = vmatprep.subr.bf16.mxu0 %v4755_v19 }
 0x473   : > { %4170 = vmatpush3.bf16.msra.mxu0 %v4678_v35 }
 0x474   : > { %4171 = vmatprep.subr.bf16.mxu0 %v4755_v19 }
 0x477   : > { %4172 = vmatpush3.bf16.msra.mxu0 %v4679_v21 }
 0x478   : > { %4173 = vmatprep.subr.bf16.mxu0 %v4755_v19 }
 0x47b   : > { %4174 = vmatpush3.bf16.msra.mxu0 %v4680_v22 }
 0x47c   : > { %4175 = vmatprep.subr.bf16.mxu0 %v4755_v19 }
 0x47f   : > { %4176 = vmatpush3.bf16.msra.mxu0 %v4681_v23 }
 0x480   : > { %4177 = vmatprep.subr.bf16.mxu0 %v4755_v19 }
 0x483   : > { %4178 = vmatpush3.bf16.msra.mxu0 %v4682_v24 }
 0x484   : > { %4179 = vmatprep.subr.bf16.mxu0 %v4755_v19 }
 0x487   : > { %4180 = vmatpush3.bf16.msra.mxu0 %v4683_v28 }
 0x51d   : > { %v4084_v31 = vpop.f32.mrb[12].mxu0 }
 0x51e   : > { %v4085_v26 = vpop.f32.mrb[13].mxu0 }
 0x51f   : > { %v4086_v29 = vadd.f32 %v4085_v26, %v4084_v31  ;;  %v4087_v30 = vpop.f32.mrb[14].mxu0  ;;  %v4106_v32 = vpop.f32.mrb[16].mxu1 }
 0x520   : > { %v4088_v33 = vpop.f32.mrb[15].mxu0  ;;  %v4107_v34 = vpop.f32.mrb[17].mxu1 }
 0x521   : > { %v3441_v36 = vadd.f32 %v4086_v29, %v3021_v25  ;;  %v4108_v37 = vadd.f32 %v4107_v34, %v4106_v32  ;;  %v4109_v38 = vpop.f32.mrb[18].mxu1 }
 0x522   : > { %v4110_v39 = vpop.f32.mrb[19].mxu1 }
 0x523   : > { %v3481_v40 = vadd.f32 %v4108_v37, %v3441_v36 }
 0x53d   : > { %v4128_v41 = vpop.f32.mrb[16].mxu0 }
 0x53e   : > { %v4129_v42 = vpop.f32.mrb[17].mxu0 }
 0x53f   : > { %v4130_v43 = vadd.f32 %v4129_v42, %v4128_v41  ;;  %v4131_v44 = vpop.f32.mrb[18].mxu0  ;;  %v4150_v45 = vpop.f32.mrb[20].mxu1 }
 0x540   : > { %v4132_v46 = vpop.f32.mrb[19].mxu0  ;;  %v4151_v47 = vpop.f32.mrb[21].mxu1 }
 0x541   : > { %v3521_v48 = vadd.f32 %v4130_v43, %v3481_v40  ;;  %v4152_v49 = vadd.f32 %v4151_v47, %v4150_v45  ;;  %v4153_v50 = vpop.f32.mrb[22].mxu1 }
 0x542   : > { %v4154_v11 = vpop.f32.mrb[23].mxu1 }
 0x543   : > { %v3561_v12 = vadd.f32 %v4152_v49, %v3521_v48 }
 0x545   : > { %v3566_v51 = vmax.f32 %v3561_v12, 0.0 }
 0x547   : > { %v3567_v52 = vpack.c.bf16 %v3566_v51, %v3566_v51 }
 0x549   : > { %4182 = vmatmul.mubr.bf16.vlgmr.msra.gmra.mrb[20].mxu0 %v3567_v52 }
 0x61c   : > { %v3667_v55 = vpop.f32.mrb[20].mxu0 }
 0x61d   : > { %v3668_v56 = vadd.f32 %v3667_v55, %v3584_v54  ;;  %v4183_v57 = vpop.f32.mrb[21].mxu0 }
 0x61e   : > { %v3670_v58 = vpop.f32.mrb[22].mxu0 }
 0x61f   : > { %v4184_v59 = vpop.f32.mrb[23].mxu0  ;;  %v3676_v60 = vsel %vm3675_vm4, %v3668_v56, -inf }
 0x620   : > { %v3678_v61 = vsel %vm3677_vm5, %v3676_v60, -inf }
 0x621   : > { %3679 = vmax.xlane.f32.xlu1 %v3678_v61 }
 0x6ae   : > { %v3680_v62 = vpop.xlane.xlu1 %3679 }
 0x6af   : > { %v3681_v63 = vsub.f32 %v3676_v60, %v3680_v62 }
 0x6b1   : > { %v3682_v0 = vmul.f32 1.442695, %v3681_v63 }
 0x6b3   : > { %4684 = vpow2.f32 %v3682_v0 }
 0x6bd   : > { %v4685_v27 = vpop.eup %4684 }
 0x6be   : > { %v3684_v1 = vsel %vm3677_vm5, %v4685_v27, 0.0 }
 0x6bf   : > { %3685 = vadd.xlane.f32.xlu0 %v3684_v1 }
 0x74c   : > { %v3686_v2 = vpop.xlane.xlu0 %3685 }
 0x74d   : > { %4686 = vlog2.f32 %v3686_v2 }
 0x757   : > { %v4687_v5 = vpop.eup %4686 }
 0x758   : > { %v3688_v6 = vmul.f32 0.6931472, %v4687_v5 }
 0x75a   : > { %v3689_v7 = vadd.f32 %v3688_v6, %v3680_v62 }
 0x75c   : > { %v3690_v8 = vsub.f32 %v3668_v56, %v3689_v7 }
 0x75e   : > { %3691 = vst [vmem:[%s324_s27] sm:$0x1] %v3690_v8 }
 0x75f   : > { %4701 = shalt.err (!%p4698_p3)
}
 0x760   : > { %s4702_s24 = scalar_lea.hbm %s5900_s29, 16  ;;  %s4706_s27 = scalar_lea.hbm %s5951_s9, 32 }
 0x761   : > { %p4703_p4 = scmp.ne.s32.totalorder %s5900_s29, %s4702_s24  ;;  %p4707_p9 = scmp.lt.u32.totalorder %s5900_s29, %s5951_s9 }
 0x762   : > { %p4708_p10 = scmp.lt.u32.totalorder %s4706_s27, %s4702_s24  ;;  %p4710_p12 = scmp.lt.u32.totalorder %s4702_s24, %s5900_s29 }
 0x763   : > { %p4704_p7 = pnand %p4703_p4, %p4846_p5 }
 0x764   : > { %p4709_p11 = por %p4708_p10, %p4707_p9 }
 0x765   : > { %p4705_p8 = pneg %p4704_p7 }
 0x766   : > { %p4711_p13 = por %p4710_p12, %p4709_p11 }
 0x768   : > { %p4712_p0 = pnand %p4711_p13, %p4705_p8 }
 0x76a   : > { %4715 = shalt.err (!%p4712_p0)
}
 0x76b   : > { %4279 = dma.vmem_to_hbm [thread:$0]  (%p4846_p5), %s5902_s28, 16, %s5900_s29, %s3693_s21  }
 0x76c PF: > { %p4285_p1 = scmp.ge.s32.totalorder %s4750_s12, 2  ;;  %s3717_s14 = sand.u32 1, %s4738_s30  }
 0x76d   : > { %s3718_s13 = scalar_lea.sflag [#allocation3], %s3717_s14 }
 0x76e   : > { %p4282_p2 = pnand %p4285_p1, %p4850_p6 }
 0x770   : > { %4733 = dma.done.wait (!%p4282_p2), %s3718_s13, 16  }
 0x771   : > { %4735 = vsyncadd (!%p4282_p2), %s3718_s13, 4294967280  ;;  %p19_p3 = scmp.ge.s32.totalorder %s4833_s15, 4   ;;  %s5954_s30 = smov %s4742_s10 }
 0x772   : > { %s5955_s10 = smov %s4746_s11  ;;  %s5956_s11 = smov %s4844_s18 }
 0x773   : > { %s5957_s12 = smov %s4833_s15  ;;  %21 = sbr.rel (!%p19_p3) target bundleno = 3 (0x3), region = 98 }
 0x77a   :  { %3722 = vsyncpa [#allocation3], 1 }
 0x77b   :  { %3724 = vsyncpa [#allocation3 + $0x1], 1 }

</bundles_post_ra>
